<compile_context>
chip_gen: v5e
topology: v5e:2x2
jax: 0.10.0
libtpu: 0.0.40
codegen_flags: <defaults>
</compile_context>

<pallas_src>
import functools

import jax
import jax.numpy as jnp
from jax import lax
from jax.experimental import pallas as pl
from jax.experimental.pallas import tpu as pltpu

K = 5  # conv kernel size of the 'upconv' decoder block


@functools.lru_cache(maxsize=None)
def _vmem_limit_bytes():
    """Generation-aware VMEM limit: ~3/4 of physical, capped at 96 MiB."""
    try:
        cap = int(pltpu.get_tpu_info().vmem_capacity_bytes)
    except Exception:
        cap = 64 * 1024 * 1024  # conservative (v7x-sized) fallback
    return int(min((cap * 3) // 4, 96 * 1024 * 1024))


def _upconv_parity_kernel(x9_ref, w_ref, b_ref, o_ref):
    """Fused Unpool(2x) -> Conv5x5 -> BN -> ReLU, tap-concatenated parity form.

    x9_ref: (1, 9*Cin, M)      bf16  9 shifted tap slices stacked on the K axis
    w_ref : (co_tile, 9*Cin)   bf16  parity-packed weights, BN scale folded in
    b_ref : (co_tile, 1)       f32   folded BN bias
    o_ref : (1, co_tile, M)    bf16  output parity phases packed on channels
    """
    acc = jnp.dot(w_ref[...], x9_ref[0],
                  preferred_element_type=jnp.float32)          # (co_tile, M) f32
    o_ref[0] = jnp.maximum(acc + b_ref[...], 0.0).astype(o_ref.dtype)


def upconv_layer(x, w9, bias):
    """One decoder layer, channels-first bf16: (N, Cin, H, W) -> (N, Cout, 2H, 2W)."""
    n, cin, h, w = x.shape
    co4, k9 = w9.shape
    assert k9 == 9 * cin
    cout = co4 // 4
    wp2 = w + 2
    m = h * wp2                      # flattened (row, padded-col) output positions

    # Zero-pad by 1 (3x3 tap halo at original resolution); 2 extra bottom rows keep
    # every tap's length-m flat slice in bounds.  Flatten (H+3, W+2) onto lanes.
    xq = jnp.pad(x, ((0, 0), (0, 0), (1, 2), (1, 1)))
    xq = xq.reshape(n, cin, (h + 3) * wp2)

    # Stage the 9 shifted tap slices ONCE (in XLA, outside the kernel) so the
    # kernel sees a single aligned, lane-dense RHS with K = 9*Cin (tap-major).
    x9 = jnp.concatenate(
        [xq[:, :, dh * wp2 + dw: dh * wp2 + dw + m]
         for dh in range(3) for dw in range(3)],
        axis=1)                                                # (n, 9*cin, m)

    # Fold the batch onto the lane axis for small early layers (m < 128) so
    # stores stay unmasked and the MXU N-dim is not padded.
    fold_batch = (m < 128) and (n > 1)
    if fold_batch:
        x9 = jnp.transpose(x9, (1, 0, 2)).reshape(1, k9, n * m)
    b_eff, _, m_eff = x9.shape

    # Tile the packed output-channel axis only for production widths so large
    # weight DMAs pipeline against compute (and v7x gets a 2nd parallel axis).
    co_tile = 256 if (co4 > 256 and co4 % 256 == 0) else co4
    n_co = co4 // co_tile
    # NOTE: for grid-invariant weight/bias blocks one could single-buffer them
    # (pipeline_mode=pl.Buffered(1)) on v7x to halve their VMEM footprint.

    flops = 2 * b_eff * co4 * k9 * m_eff
    bytes_accessed = (x9.size * 2 + w9.size * 2 + bias.size * 4
                      + b_eff * co4 * m_eff * 2)

    # TODO(synk): for spatial sizes too large for whole-image VMEM residency,
    # band H with halo tiles (manual make_async_copy) instead of full-image blocks.
    out_p = pl.pallas_call(
        _upconv_parity_kernel,
        out_shape=jax.ShapeDtypeStruct((b_eff, co4, m_eff), jnp.bfloat16),
        grid=(b_eff, n_co),
        in_specs=[
            pl.BlockSpec((1, k9, m_eff), lambda b, c: (b, 0, 0)),
            pl.BlockSpec((co_tile, k9), lambda b, c: (c, 0)),
            pl.BlockSpec((co_tile, 1), lambda b, c: (c, 0)),
        ],
        out_specs=pl.BlockSpec((1, co_tile, m_eff), lambda b, c: (b, c, 0)),
        compiler_params=pltpu.CompilerParams(
            dimension_semantics=("parallel", "parallel"),
            vmem_limit_bytes=_vmem_limit_bytes()),
        cost_estimate=pl.CostEstimate(
            flops=flops, transcendentals=0, bytes_accessed=bytes_accessed),
    )(x9, w9, bias)

    if fold_batch:
        out_p = jnp.transpose(out_p.reshape(co4, n, m), (1, 0, 2))   # (n, co4, m)

    # Drop the 2 padded columns per row (deliberately-garbage flat-slice wrap)
    # and interleave the 4 parity phases back into the 2x-upsampled grid
    # (packed channel index = (2*py+px)*Cout + c).
    # TODO(synk): for large activations, have the next layer consume the packed
    # (n, 4*Cout, h, w+2) layout directly instead of this HBM transpose.
    y = out_p.reshape(n, 2, 2, cout, h, wp2)[..., :w]   # (n, py, px, cout, h, w)
    y = jnp.transpose(y, (0, 3, 4, 1, 5, 2))            # (n, cout, h, py, w, px)
    return y.reshape(n, cout, 2 * h, 2 * w)


def _fold_and_pack(wconv, gamma, beta, mean, var, eps=1e-5):
    """Fold BatchNorm into the conv weights; pack taps + parities for ONE dot.

    Returns
      w9  : (4*Cout, 9*Cin) bf16 — row = packed output channel
            (2*py+px)*Cout + c; column = tap-major (dh, dw, cin).  Entry holds
            conv tap (kh, kw) = (2*dh - py, 2*dw - px) scaled by the BN scale
            (zero where that tap index is invalid).
      bias: (4*Cout, 1) f32 — folded BN bias, repeated for the 4 parities.
    """
    cout, cin, _, _ = wconv.shape
    scale = gamma / jnp.sqrt(var + eps)                       # (cout,)
    w_s = wconv * scale[:, None, None, None]                  # fold BN scale into W
    bias = beta - mean * scale                                # (cout,)

    t = lambda a: jnp.transpose(a, (2, 3, 0, 1))              # (co,ci,kh,kw)->(kh,kw,co,ci)
    wc = jnp.zeros((3, 3, 2, 2, cout, cin), jnp.float32)      # [dh, dw, py, px, co, ci]
    wc = wc.at[:, :, 0, 0].set(t(w_s[:, :, 0::2, 0::2]))      # even kh, even kw
    wc = wc.at[:, 1:, 0, 1].set(t(w_s[:, :, 0::2, 1::2]))     # even kh, odd  kw
    wc = wc.at[1:, :, 1, 0].set(t(w_s[:, :, 1::2, 0::2]))     # odd  kh, even kw
    wc = wc.at[1:, 1:, 1, 1].set(t(w_s[:, :, 1::2, 1::2]))    # odd  kh, odd  kw
    wc = wc.reshape(3, 3, 4 * cout, cin)                      # packed co axis
    # Collapse the 9 taps onto the contraction axis: (4*Cout, 9*Cin), tap-major.
    w9 = jnp.transpose(wc, (2, 0, 1, 3)).reshape(4 * cout, 9 * cin)
    w9 = w9.astype(jnp.bfloat16)
    bias4 = jnp.tile(bias, 4).reshape(4 * cout, 1).astype(jnp.float32)
    return w9, bias4


def _decoder_forward(x_nchw, params):
    """Decoder.forward: x -> layer1 -> layer2 -> layer3 -> layer4 (NCHW in/out)."""
    x = x_nchw.astype(jnp.bfloat16)
    for (wconv, gamma, beta, mean, var) in params:
        w9, bias = _fold_and_pack(wconv, gamma, beta, mean, var)
        x = upconv_layer(x, w9, bias)
    return x.astype(jnp.float32)


decoder_forward = jax.jit(_decoder_forward)


def init_decoder_params(in_channels, key):
    """Deterministic params for 4 upconv layers (channels halved each layer)."""
    params = []
    c = in_channels
    for _ in range(4):
        cout = c // 2
        key, wkey = jax.random.split(key)
        fan_in = c * K * K
        wconv = jax.random.normal(wkey, (cout, c, K, K), jnp.float32) * jnp.sqrt(
            2.0 / fan_in)
        gamma = jnp.ones((cout,), jnp.float32)    # fresh BatchNorm2d (eval mode)
        beta = jnp.zeros((cout,), jnp.float32)
        mean = jnp.zeros((cout,), jnp.float32)
        var = jnp.ones((cout,), jnp.float32)
        params.append((wconv, gamma, beta, mean, var))
        c = cout
    return params


def _unpool2x(x):
    """s2d Unpool: 2x upsample by zero insertion (value at top-left of each 2x2)."""
    n, c, h, w = x.shape
    y = jnp.zeros((n, c, h, 2, w, 2), x.dtype)
    y = y.at[:, :, :, 0, :, 0].set(x)
    return y.reshape(n, c, 2 * h, 2 * w)


def decoder_reference(x, params, eps=1e-5):
    """Pure-JAX f32 reference (lax.conv, NCHW) for correctness checking."""
    for (wconv, gamma, beta, mean, var) in params:
        x = _unpool2x(x)
        x = lax.conv_general_dilated(
            x, wconv, window_strides=(1, 1), padding=[(2, 2), (2, 2)],
            dimension_numbers=("NCHW", "OIHW", "NCHW"),
            precision=lax.Precision.HIGHEST)
        s = (gamma / jnp.sqrt(var + eps))[None, :, None, None]
        x = (x - mean[None, :, None, None]) * s + beta[None, :, None, None]
        x = jnp.maximum(x, 0.0)
    return x


if __name__ == "__main__":
    key = jax.random.PRNGKey(0)
    key, xkey, pkey = jax.random.split(key, 3)

    # Small NCHW input consistent with a decoder head: (N=2, C=32, H=8, W=8).
    N, C, H, W = 2, 32, 8, 8
    x = jax.random.normal(xkey, (N, C, H, W), jnp.float32)
    params = init_decoder_params(C, pkey)

    out = jax.block_until_ready(decoder_forward(x, params))

    # Output: channels /16, spatial x16 (four 2x upsampling conv layers).
    assert out.shape == (N, C // 16, 16 * H, 16 * W), out.shape

    ref = jax.block_until_ready(decoder_reference(x, params))
    max_err = float(jnp.max(jnp.abs(out - ref)))
    if not bool(jnp.allclose(out, ref, atol=2e-2, rtol=2e-2)):
        raise AssertionError(f"Pallas decoder mismatch vs reference: max_err={max_err}")

    print("KERNEL_OK")
</pallas_src>

<mosaic_0001>
module attributes {stable_mosaic.version = 11 : i64} {
  func.func @_upconv_parity_kernel(%arg0: i32, %arg1: i32, %arg2: memref<1x288x160xbf16, #tpu.memory_space<vmem>>, %arg3: memref<64x288xbf16, #tpu.memory_space<vmem>>, %arg4: memref<64x1xf32, #tpu.memory_space<vmem>>, %arg5: memref<1x64x160xbf16, #tpu.memory_space<vmem>>) attributes {dimension_semantics = [#tpu.dimension_semantics<parallel>, #tpu.dimension_semantics<parallel>], iteration_bounds = array<i64: 1, 1>, scalar_prefetch = 0 : i64, scratch_operands = 0 : i64, tpu.core_type = #tpu.core_type<tc>, window_params = [{transform_indices = @transform_0, window_bounds = array<i64: 1, 288, 160>}, {transform_indices = @transform_1, window_bounds = array<i64: 64, 288>}, {transform_indices = @transform_2, window_bounds = array<i64: 64, 1>}, {transform_indices = @transform_3, window_bounds = array<i64: 1, 64, 160>}]} {
    %c0 = arith.constant 0 : index
    %c0_0 = arith.constant 0 : index
    %0 = vector.load %arg3[%c0, %c0_0] : memref<64x288xbf16, #tpu.memory_space<vmem>>, vector<64x288xbf16>
    %c0_1 = arith.constant 0 : index
    %c0_2 = arith.constant 0 : index
    %c0_3 = arith.constant 0 : index
    %1 = vector.load %arg2[%c0_1, %c0_2, %c0_3] : memref<1x288x160xbf16, #tpu.memory_space<vmem>>, vector<1x288x160xbf16>
    %2 = vector.shape_cast %1 : vector<1x288x160xbf16> to vector<288x160xbf16>
    %cst = arith.constant dense<0.000000e+00> : vector<64x160xf32>
    %3 = tpu.matmul %0, %2, %cst {dimension_numbers = #tpu.dot_dimension_numbers<[1], [0], [0], [1], [0, 0, 1, 1], [], []>} : vector<64x288xbf16>, vector<288x160xbf16>, vector<64x160xf32> -> vector<64x160xf32>
    %c0_4 = arith.constant 0 : index
    %c0_5 = arith.constant 0 : index
    %4 = vector.load %arg4[%c0_4, %c0_5] : memref<64x1xf32, #tpu.memory_space<vmem>>, vector<64x1xf32>
    %5 = vector.broadcast %4 : vector<64x1xf32> to vector<64x160xf32>
    %6 = arith.addf %3, %5 : vector<64x160xf32>
    %cst_6 = arith.constant 0.000000e+00 : f32
    %7 = vector.broadcast %cst_6 : f32 to vector<64x160xf32>
    %8 = arith.maximumf %6, %7 : vector<64x160xf32>
    %9 = arith.truncf %8 : vector<64x160xf32> to vector<64x160xbf16>
    %c0_7 = arith.constant 0 : index
    %c0_8 = arith.constant 0 : index
    %c0_9 = arith.constant 0 : index
    %10 = vector.load %arg5[%c0_7, %c0_8, %c0_9] : memref<1x64x160xbf16, #tpu.memory_space<vmem>>, vector<1x64x160xbf16>
    %11 = vector.shape_cast %10 : vector<1x64x160xbf16> to vector<64x160xbf16>
    %12 = vector.shape_cast %9 : vector<64x160xbf16> to vector<1x64x160xbf16>
    tpu.vector_store %arg5[%c0_7, %c0_8, %c0_9], %12 {strides = array<i32>} : memref<1x64x160xbf16, #tpu.memory_space<vmem>>, vector<1x64x160xbf16>,
    return
  }
  func.func @transform_0(%arg0: i32, %arg1: i32) -> (i32, i32, i32) {
    %c0_i32 = arith.constant 0 : i32
    %c0_i32_0 = arith.constant 0 : i32
    %c0_i32_1 = arith.constant 0 : i32
    return %arg0, %c0_i32, %c0_i32_0 : i32, i32, i32
  }
  func.func @transform_1(%arg0: i32, %arg1: i32) -> (i32, i32) {
    %c0_i32 = arith.constant 0 : i32
    %c0_i32_0 = arith.constant 0 : i32
    return %arg1, %c0_i32 : i32, i32
  }
  func.func @transform_2(%arg0: i32, %arg1: i32) -> (i32, i32) {
    %c0_i32 = arith.constant 0 : i32
    %c0_i32_0 = arith.constant 0 : i32
    return %arg1, %c0_i32 : i32, i32
  }
  func.func @transform_3(%arg0: i32, %arg1: i32) -> (i32, i32, i32) {
    %c0_i32 = arith.constant 0 : i32
    %c0_i32_0 = arith.constant 0 : i32
    return %arg0, %arg1, %c0_i32 : i32, i32, i32
  }
}

module attributes {stable_mosaic.version = 11 : i64} {
  func.func @_upconv_parity_kernel(%arg0: i32, %arg1: i32, %arg2: memref<1x144x288xbf16, #tpu.memory_space<vmem>>, %arg3: memref<32x144xbf16, #tpu.memory_space<vmem>>, %arg4: memref<32x1xf32, #tpu.memory_space<vmem>>, %arg5: memref<1x32x288xbf16, #tpu.memory_space<vmem>>) attributes {dimension_semantics = [#tpu.dimension_semantics<parallel>, #tpu.dimension_semantics<parallel>], iteration_bounds = array<i64: 2, 1>, scalar_prefetch = 0 : i64, scratch_operands = 0 : i64, tpu.core_type = #tpu.core_type<tc>, window_params = [{transform_indices = @transform_0, window_bounds = array<i64: 1, 144, 288>}, {transform_indices = @transform_1, window_bounds = array<i64: 32, 144>}, {transform_indices = @transform_2, window_bounds = array<i64: 32, 1>}, {transform_indices = @transform_3, window_bounds = array<i64: 1, 32, 288>}]} {
    %c0 = arith.constant 0 : index
    %c0_0 = arith.constant 0 : index
    %0 = vector.load %arg3[%c0, %c0_0] : memref<32x144xbf16, #tpu.memory_space<vmem>>, vector<32x144xbf16>
    %c0_1 = arith.constant 0 : index
    %c0_2 = arith.constant 0 : index
    %c0_3 = arith.constant 0 : index
    %1 = vector.load %arg2[%c0_1, %c0_2, %c0_3] : memref<1x144x288xbf16, #tpu.memory_space<vmem>>, vector<1x144x288xbf16>
    %2 = vector.shape_cast %1 : vector<1x144x288xbf16> to vector<144x288xbf16>
    %cst = arith.constant dense<0.000000e+00> : vector<32x288xf32>
    %3 = tpu.matmul %0, %2, %cst {dimension_numbers = #tpu.dot_dimension_numbers<[1], [0], [0], [1], [0, 0, 1, 1], [], []>} : vector<32x144xbf16>, vector<144x288xbf16>, vector<32x288xf32> -> vector<32x288xf32>
    %c0_4 = arith.constant 0 : index
    %c0_5 = arith.constant 0 : index
    %4 = vector.load %arg4[%c0_4, %c0_5] : memref<32x1xf32, #tpu.memory_space<vmem>>, vector<32x1xf32>
    %5 = vector.broadcast %4 : vector<32x1xf32> to vector<32x288xf32>
    %6 = arith.addf %3, %5 : vector<32x288xf32>
    %cst_6 = arith.constant 0.000000e+00 : f32
    %7 = vector.broadcast %cst_6 : f32 to vector<32x288xf32>
    %8 = arith.maximumf %6, %7 : vector<32x288xf32>
    %9 = arith.truncf %8 : vector<32x288xf32> to vector<32x288xbf16>
    %c0_7 = arith.constant 0 : index
    %c0_8 = arith.constant 0 : index
    %c0_9 = arith.constant 0 : index
    %10 = vector.load %arg5[%c0_7, %c0_8, %c0_9] : memref<1x32x288xbf16, #tpu.memory_space<vmem>>, vector<1x32x288xbf16>
    %11 = vector.shape_cast %10 : vector<1x32x288xbf16> to vector<32x288xbf16>
    %12 = vector.shape_cast %9 : vector<32x288xbf16> to vector<1x32x288xbf16>
    tpu.vector_store %arg5[%c0_7, %c0_8, %c0_9], %12 {strides = array<i32>} : memref<1x32x288xbf16, #tpu.memory_space<vmem>>, vector<1x32x288xbf16>,
    return
  }
  func.func @transform_0(%arg0: i32, %arg1: i32) -> (i32, i32, i32) {
    %c0_i32 = arith.constant 0 : i32
    %c0_i32_0 = arith.constant 0 : i32
    %c0_i32_1 = arith.constant 0 : i32
    return %arg0, %c0_i32, %c0_i32_0 : i32, i32, i32
  }
  func.func @transform_1(%arg0: i32, %arg1: i32) -> (i32, i32) {
    %c0_i32 = arith.constant 0 : i32
    %c0_i32_0 = arith.constant 0 : i32
    return %arg1, %c0_i32 : i32, i32
  }
  func.func @transform_2(%arg0: i32, %arg1: i32) -> (i32, i32) {
    %c0_i32 = arith.constant 0 : i32
    %c0_i32_0 = arith.constant 0 : i32
    return %arg1, %c0_i32 : i32, i32
  }
  func.func @transform_3(%arg0: i32, %arg1: i32) -> (i32, i32, i32) {
    %c0_i32 = arith.constant 0 : i32
    %c0_i32_0 = arith.constant 0 : i32
    return %arg0, %arg1, %c0_i32 : i32, i32, i32
  }
}

module attributes {stable_mosaic.version = 11 : i64} {
  func.func @_upconv_parity_kernel(%arg0: i32, %arg1: i32, %arg2: memref<1x72x1088xbf16, #tpu.memory_space<vmem>>, %arg3: memref<16x72xbf16, #tpu.memory_space<vmem>>, %arg4: memref<16x1xf32, #tpu.memory_space<vmem>>, %arg5: memref<1x16x1088xbf16, #tpu.memory_space<vmem>>) attributes {dimension_semantics = [#tpu.dimension_semantics<parallel>, #tpu.dimension_semantics<parallel>], iteration_bounds = array<i64: 2, 1>, scalar_prefetch = 0 : i64, scratch_operands = 0 : i64, tpu.core_type = #tpu.core_type<tc>, window_params = [{transform_indices = @transform_0, window_bounds = array<i64: 1, 72, 1088>}, {transform_indices = @transform_1, window_bounds = array<i64: 16, 72>}, {transform_indices = @transform_2, window_bounds = array<i64: 16, 1>}, {transform_indices = @transform_3, window_bounds = array<i64: 1, 16, 1088>}]} {
    %c0 = arith.constant 0 : index
    %c0_0 = arith.constant 0 : index
    %0 = vector.load %arg3[%c0, %c0_0] : memref<16x72xbf16, #tpu.memory_space<vmem>>, vector<16x72xbf16>
    %c0_1 = arith.constant 0 : index
    %c0_2 = arith.constant 0 : index
    %c0_3 = arith.constant 0 : index
    %1 = vector.load %arg2[%c0_1, %c0_2, %c0_3] : memref<1x72x1088xbf16, #tpu.memory_space<vmem>>, vector<1x72x1088xbf16>
    %2 = vector.shape_cast %1 : vector<1x72x1088xbf16> to vector<72x1088xbf16>
    %cst = arith.constant dense<0.000000e+00> : vector<16x1088xf32>
    %3 = tpu.matmul %0, %2, %cst {dimension_numbers = #tpu.dot_dimension_numbers<[1], [0], [0], [1], [0, 0, 1, 1], [], []>} : vector<16x72xbf16>, vector<72x1088xbf16>, vector<16x1088xf32> -> vector<16x1088xf32>
    %c0_4 = arith.constant 0 : index
    %c0_5 = arith.constant 0 : index
    %4 = vector.load %arg4[%c0_4, %c0_5] : memref<16x1xf32, #tpu.memory_space<vmem>>, vector<16x1xf32>
    %5 = vector.broadcast %4 : vector<16x1xf32> to vector<16x1088xf32>
    %6 = arith.addf %3, %5 : vector<16x1088xf32>
    %cst_6 = arith.constant 0.000000e+00 : f32
    %7 = vector.broadcast %cst_6 : f32 to vector<16x1088xf32>
    %8 = arith.maximumf %6, %7 : vector<16x1088xf32>
    %9 = arith.truncf %8 : vector<16x1088xf32> to vector<16x1088xbf16>
    %c0_7 = arith.constant 0 : index
    %c0_8 = arith.constant 0 : index
    %c0_9 = arith.constant 0 : index
    %10 = vector.load %arg5[%c0_7, %c0_8, %c0_9] : memref<1x16x1088xbf16, #tpu.memory_space<vmem>>, vector<1x16x1088xbf16>
    %11 = vector.shape_cast %10 : vector<1x16x1088xbf16> to vector<16x1088xbf16>
    %12 = vector.shape_cast %9 : vector<16x1088xbf16> to vector<1x16x1088xbf16>
    tpu.vector_store %arg5[%c0_7, %c0_8, %c0_9], %12 {strides = array<i32>} : memref<1x16x1088xbf16, #tpu.memory_space<vmem>>, vector<1x16x1088xbf16>,
    return
  }
  func.func @transform_0(%arg0: i32, %arg1: i32) -> (i32, i32, i32) {
    %c0_i32 = arith.constant 0 : i32
    %c0_i32_0 = arith.constant 0 : i32
    %c0_i32_1 = arith.constant 0 : i32
    return %arg0, %c0_i32, %c0_i32_0 : i32, i32, i32
  }
  func.func @transform_1(%arg0: i32, %arg1: i32) -> (i32, i32) {
    %c0_i32 = arith.constant 0 : i32
    %c0_i32_0 = arith.constant 0 : i32
    return %arg1, %c0_i32 : i32, i32
  }
  func.func @transform_2(%arg0: i32, %arg1: i32) -> (i32, i32) {
    %c0_i32 = arith.constant 0 : i32
    %c0_i32_0 = arith.constant 0 : i32
    return %arg1, %c0_i32 : i32, i32
  }
  func.func @transform_3(%arg0: i32, %arg1: i32) -> (i32, i32, i32) {
    %c0_i32 = arith.constant 0 : i32
    %c0_i32_0 = arith.constant 0 : i32
    return %arg0, %arg1, %c0_i32 : i32, i32, i32
  }
}

module attributes {stable_mosaic.version = 11 : i64} {
  func.func @_upconv_parity_kernel(%arg0: i32, %arg1: i32, %arg2: memref<1x36x4224xbf16, #tpu.memory_space<vmem>>, %arg3: memref<8x36xbf16, #tpu.memory_space<vmem>>, %arg4: memref<8x1xf32, #tpu.memory_space<vmem>>, %arg5: memref<1x8x4224xbf16, #tpu.memory_space<vmem>>) attributes {dimension_semantics = [#tpu.dimension_semantics<parallel>, #tpu.dimension_semantics<parallel>], iteration_bounds = array<i64: 2, 1>, scalar_prefetch = 0 : i64, scratch_operands = 0 : i64, tpu.core_type = #tpu.core_type<tc>, window_params = [{transform_indices = @transform_0, window_bounds = array<i64: 1, 36, 4224>}, {transform_indices = @transform_1, window_bounds = array<i64: 8, 36>}, {transform_indices = @transform_2, window_bounds = array<i64: 8, 1>}, {transform_indices = @transform_3, window_bounds = array<i64: 1, 8, 4224>}]} {
    %c0 = arith.constant 0 : index
    %c0_0 = arith.constant 0 : index
    %0 = vector.load %arg3[%c0, %c0_0] : memref<8x36xbf16, #tpu.memory_space<vmem>>, vector<8x36xbf16>
    %c0_1 = arith.constant 0 : index
    %c0_2 = arith.constant 0 : index
    %c0_3 = arith.constant 0 : index
    %1 = vector.load %arg2[%c0_1, %c0_2, %c0_3] : memref<1x36x4224xbf16, #tpu.memory_space<vmem>>, vector<1x36x4224xbf16>
    %2 = vector.shape_cast %1 : vector<1x36x4224xbf16> to vector<36x4224xbf16>
    %cst = arith.constant dense<0.000000e+00> : vector<8x4224xf32>
    %3 = tpu.matmul %0, %2, %cst {dimension_numbers = #tpu.dot_dimension_numbers<[1], [0], [0], [1], [0, 0, 1, 1], [], []>} : vector<8x36xbf16>, vector<36x4224xbf16>, vector<8x4224xf32> -> vector<8x4224xf32>
    %c0_4 = arith.constant 0 : index
    %c0_5 = arith.constant 0 : index
    %4 = vector.load %arg4[%c0_4, %c0_5] : memref<8x1xf32, #tpu.memory_space<vmem>>, vector<8x1xf32>
    %5 = vector.broadcast %4 : vector<8x1xf32> to vector<8x4224xf32>
    %6 = arith.addf %3, %5 : vector<8x4224xf32>
    %cst_6 = arith.constant 0.000000e+00 : f32
    %7 = vector.broadcast %cst_6 : f32 to vector<8x4224xf32>
    %8 = arith.maximumf %6, %7 : vector<8x4224xf32>
    %9 = arith.truncf %8 : vector<8x4224xf32> to vector<8x4224xbf16>
    %c0_7 = arith.constant 0 : index
    %c0_8 = arith.constant 0 : index
    %c0_9 = arith.constant 0 : index
    %10 = vector.load %arg5[%c0_7, %c0_8, %c0_9] : memref<1x8x4224xbf16, #tpu.memory_space<vmem>>, vector<1x8x4224xbf16>
    %11 = vector.shape_cast %10 : vector<1x8x4224xbf16> to vector<8x4224xbf16>
    %12 = vector.shape_cast %9 : vector<8x4224xbf16> to vector<1x8x4224xbf16>
    tpu.vector_store %arg5[%c0_7, %c0_8, %c0_9], %12 {strides = array<i32>} : memref<1x8x4224xbf16, #tpu.memory_space<vmem>>, vector<1x8x4224xbf16>,
    return
  }
  func.func @transform_0(%arg0: i32, %arg1: i32) -> (i32, i32, i32) {
    %c0_i32 = arith.constant 0 : i32
    %c0_i32_0 = arith.constant 0 : i32
    %c0_i32_1 = arith.constant 0 : i32
    return %arg0, %c0_i32, %c0_i32_0 : i32, i32, i32
  }
  func.func @transform_1(%arg0: i32, %arg1: i32) -> (i32, i32) {
    %c0_i32 = arith.constant 0 : i32
    %c0_i32_0 = arith.constant 0 : i32
    return %arg1, %c0_i32 : i32, i32
  }
  func.func @transform_2(%arg0: i32, %arg1: i32) -> (i32, i32) {
    %c0_i32 = arith.constant 0 : i32
    %c0_i32_0 = arith.constant 0 : i32
    return %arg1, %c0_i32 : i32, i32
  }
  func.func @transform_3(%arg0: i32, %arg1: i32) -> (i32, i32, i32) {
    %c0_i32 = arith.constant 0 : i32
    %c0_i32_0 = arith.constant 0 : i32
    return %arg0, %arg1, %c0_i32 : i32, i32, i32
  }
}

</mosaic_0001>

<bundles_post_ra>
// kernel: tile.23
= control target key start
LH: loop header
LB: loop body
LE: loop exit
PB: predicated region body
PF: predicated region fallthrough
CT: control target
= control target key end

     0   :  { %s22_s0 = inlined_call_operand.vmem [shape: f32[16], index: 0, kind: input, shape index: {}]   ;;  %s23_s1 = inlined_call_operand.vmem [shape: f32[4,16], index: 1, kind: output, shape index: {}]  }
   0x1   :  { %v4_v0 = vld [vmem:[%s22_s0] ss:$0 sm:$0xff] }
   0x2   :  { %5 = vst [vmem:[%s23_s1] sm:$0xf] %v4_v0 }

// kernel: tile.33
= control target key start
LH: loop header
LB: loop body
LE: loop exit
PB: predicated region body
PF: predicated region fallthrough
CT: control target
= control target key end

     0   :  { %s22_s0 = inlined_call_operand.vmem [shape: f32[4], index: 0, kind: input, shape index: {}]   ;;  %s23_s1 = inlined_call_operand.vmem [shape: f32[4,4], index: 1, kind: output, shape index: {}]  }
   0x1   :  { %v4_v0 = vld [vmem:[%s22_s0] ss:$0 sm:$0xff] }
   0x2   :  { %5 = vst [vmem:[%s23_s1] sm:$0xf] %v4_v0 }

// kernel: tile.38
= control target key start
LH: loop header
LB: loop body
LE: loop exit
PB: predicated region body
PF: predicated region fallthrough
CT: control target
= control target key end

     0   :  { %s22_s0 = inlined_call_operand.vmem [shape: f32[2], index: 0, kind: input, shape index: {}]   ;;  %s23_s1 = inlined_call_operand.vmem [shape: f32[4,2], index: 1, kind: output, shape index: {}]  }
   0x1   :  { %v4_v0 = vld [vmem:[%s22_s0] ss:$0 sm:$0xff] }
   0x2   :  { %5 = vst [vmem:[%s23_s1] sm:$0xf] %v4_v0 }

// kernel: tile.28
= control target key start
LH: loop header
LB: loop body
LE: loop exit
PB: predicated region body
PF: predicated region fallthrough
CT: control target
= control target key end

     0   :  { %s22_s0 = inlined_call_operand.vmem [shape: f32[8], index: 0, kind: input, shape index: {}]   ;;  %s23_s1 = inlined_call_operand.vmem [shape: f32[4,8], index: 1, kind: output, shape index: {}]  }
   0x1   :  { %v4_v0 = vld [vmem:[%s22_s0] ss:$0 sm:$0xff] }
   0x2   :  { %5 = vst [vmem:[%s23_s1] sm:$0xf] %v4_v0 }

// kernel: tile.3
= control target key start
LH: loop header
LB: loop body
LE: loop exit
PB: predicated region body
PF: predicated region fallthrough
CT: control target
= control target key end

     0   :  { %vm7_vm0 = vcmask 7168   ;;  %s37_s0 = inlined_call_operand.vmem [shape: f32[4,2], index: 0, kind: input, shape index: {}]   ;;  %s38_s1 = inlined_call_operand.vmem [shape: f32[8,1], index: 1, kind: output, shape index: {}]  }
   0x1   :  { %v4_v0 = vld [vmem:[%s37_s0] sm:$0xf]  ;;  %s17_s0 = smov 127  }
   0x2   :  { %5 = vst [vmem:[#allocation0] sm:$0xf] %v4_v0 }
   0x9   :  { %v9_v1 = vld [vmem:[#allocation0] sm:$0xf]  }
   0xa   :  { %v6_v2 = vld [vmem:[#allocation0] sm:$0xf]   ;;  %10 = vrot.lane.b32.xlu0 %v9_v1, %s17_s0 }
   0xb   :  { %8 = vst.msk [vmem:[%s38_s1] ss:$2 sm:$0xf] %vm7_vm0, %v6_v2  }
  0x7c   :  { %v11_v3 = vpop.permute.xlu0 %10  }
  0x7d   :  { %15 = vst.msk [vmem:[%s38_s1 + $0x1] ss:$2 sm:$0xf] %vm7_vm0, %v11_v3  }

// kernel: tile.2
= control target key start
LH: loop header
LB: loop body
LE: loop exit
PB: predicated region body
PF: predicated region fallthrough
CT: control target
= control target key end

     0   :  { %s34_s8 = smov 125   ;;  %s35_s9 = smov 126   ;;  %vm7_vm0 = vcmask 7168   ;;  %s61_s0 = inlined_call_operand.vmem [shape: f32[4,4], index: 0, kind: input, shape index: {}]   ;;  %s62_s1 = inlined_call_operand.vmem [shape: f32[16,1], index: 1, kind: output, shape index: {}]  }
   0x1   :  { %v4_v0 = vld [vmem:[%s61_s0] sm:$0xf]  ;;  %s33_s0 = smov 127  }
   0x2   :  { %5 = vst [vmem:[#allocation0] sm:$0xf] %v4_v0 }
   0x9   :  { %v9_v1 = vld [vmem:[#allocation0] sm:$0xf]  }
   0xa   :  { %v21_v2 = vld [vmem:[#allocation0] sm:$0xf]   ;;  %10 = vrot.lane.b32.xlu0 %v9_v1, %s33_s0 }
   0xb   :  { %22 = vrot.lane.b32.xlu1 %v21_v2, %s34_s8  ;;  %v15_v3 = vld [vmem:[#allocation0] sm:$0xf]  }
   0xc   :  { %v6_v4 = vld [vmem:[#allocation0] sm:$0xf]  }
   0xd   :  { %8 = vst.msk [vmem:[%s62_s1] ss:$4 sm:$0xf] %vm7_vm0, %v6_v4  }
  0x12   :  { %16 = vrot.lane.b32.xlu0 %v15_v3, %s35_s9 }
  0x7c   :  { %v11_v5 = vpop.permute.xlu0 %10  }
  0x7d   :  { %v23_v6 = vpop.permute.xlu1 %22   ;;  %27 = vst.msk [vmem:[%s62_s1 + $0x1] ss:$4 sm:$0xf] %vm7_vm0, %v11_v5  }
  0x7e   :  { %29 = vst.msk [vmem:[%s62_s1 + $0x3] ss:$4 sm:$0xf] %vm7_vm0, %v23_v6  }
  0x84   :  { %v17_v7 = vpop.permute.xlu0 %16  }
  0x85   :  { %28 = vst.msk [vmem:[%s62_s1 + $0x2] ss:$4 sm:$0xf] %vm7_vm0, %v17_v7  }

// kernel: tile.1
= control target key start
LH: loop header
LB: loop body
LE: loop exit
PB: predicated region body
PF: predicated region fallthrough
CT: control target
= control target key end

     0   :  { %s66_s8 = smov 125   ;;  %s67_s9 = smov 123   ;;  %vm7_vm0 = vcmask 7168   ;;  %s117_s0 = inlined_call_operand.vmem [shape: f32[4,8], index: 0, kind: input, shape index: {}]   ;;  %s118_s1 = inlined_call_operand.vmem [shape: f32[32,1], index: 1, kind: output, shape index: {}]  }
   0x1   :  { %v4_v0 = vld [vmem:[%s117_s0] sm:$0xf]  ;;  %s65_s0 = smov 127   ;;  %s68_s10 = smov 126  }
   0x2   :  { %5 = vst [vmem:[#allocation0] sm:$0xf] %v4_v0  ;;  %s69_s11 = smov 124   ;;  %s70_s12 = smov 122  }
   0x3   :  { %s71_s13 = smov 121  }
   0x9   :  { %v9_v1 = vld [vmem:[#allocation0] sm:$0xf]  }
   0xa   :  { %v21_v2 = vld [vmem:[#allocation0] sm:$0xf]   ;;  %10 = vrot.lane.b32.xlu0 %v9_v1, %s65_s0 }
   0xb   :  { %22 = vrot.lane.b32.xlu1 %v21_v2, %s66_s8  ;;  %v33_v3 = vld [vmem:[#allocation0] sm:$0xf]  }
   0xc   :  { %34 = vrot.lane.b32.xlu2 %v33_v3, %s67_s9  ;;  %v15_v4 = vld [vmem:[#allocation0] sm:$0xf]  }
   0xd   :  { %v27_v5 = vld [vmem:[#allocation0] sm:$0xf]  }
   0xe   :  { %v39_v6 = vld [vmem:[#allocation0] sm:$0xf]  }
   0xf   :  { %v45_v7 = vld [vmem:[#allocation0] sm:$0xf]  }
  0x10   :  { %v6_v8 = vld [vmem:[#allocation0] sm:$0xf]  }
  0x11   :  { %8 = vst.msk [vmem:[%s118_s1] ss:$8 sm:$0xf] %vm7_vm0, %v6_v8  }
  0x12   :  { %16 = vrot.lane.b32.xlu0 %v15_v4, %s68_s10 }
  0x13   :  { %28 = vrot.lane.b32.xlu1 %v27_v5, %s69_s11 }
  0x14   :  { %40 = vrot.lane.b32.xlu2 %v39_v6, %s70_s12 }
  0x1a   :  { %46 = vrot.lane.b32.xlu0 %v45_v7, %s71_s13 }
  0x66   :  { %v35_v9 = vpop.permute.xlu2 %34  }
  0x67   :  { %55 = vst.msk [vmem:[%s118_s1 + $0x5] ss:$8 sm:$0xf] %vm7_vm0, %v35_v9  }
  0x6e   :  { %v41_v10 = vpop.permute.xlu2 %40  }
  0x6f   :  { %56 = vst.msk [vmem:[%s118_s1 + $0x6] ss:$8 sm:$0xf] %vm7_vm0, %v41_v10  }
  0x7c   :  { %v11_v11 = vpop.permute.xlu0 %10  }
  0x7d   :  { %v23_v12 = vpop.permute.xlu1 %22   ;;  %51 = vst.msk [vmem:[%s118_s1 + $0x1] ss:$8 sm:$0xf] %vm7_vm0, %v11_v11  }
  0x7e   :  { %53 = vst.msk [vmem:[%s118_s1 + $0x3] ss:$8 sm:$0xf] %vm7_vm0, %v23_v12  }
  0x84   :  { %v17_v13 = vpop.permute.xlu0 %16  }
  0x85   :  { %v29_v14 = vpop.permute.xlu1 %28   ;;  %52 = vst.msk [vmem:[%s118_s1 + $0x2] ss:$8 sm:$0xf] %vm7_vm0, %v17_v13  }
  0x86   :  { %54 = vst.msk [vmem:[%s118_s1 + $0x4] ss:$8 sm:$0xf] %vm7_vm0, %v29_v14  }
  0x8c   :  { %v47_v15 = vpop.permute.xlu0 %46  }
  0x8d   :  { %57 = vst.msk [vmem:[%s118_s1 + $0x7] ss:$8 sm:$0xf] %vm7_vm0, %v47_v15  }

// kernel: tile.0
= control target key start
LH: loop header
LB: loop body
LE: loop exit
PB: predicated region body
PF: predicated region fallthrough
CT: control target
= control target key end

     0   :  { %s176_s8 = smov 127   ;;  %s177_s9 = smov 123   ;;  %vm7_vm0 = vcmask 7168   ;;  %s331_s0 = inlined_call_operand.vmem [shape: f32[4,16], index: 0, kind: input, shape index: {}]   ;;  %s332_s1 = inlined_call_operand.vmem [shape: f32[64,1], index: 1, kind: output, shape index: {}]  }
   0x1   :  { %v4_v0 = vld [vmem:[%s331_s0] sm:$0xf]  ;;  %s175_s0 = smov 125   ;;  %s178_s10 = smov 124  }
   0x2   :  { %5 = vst [vmem:[#allocation0] sm:$0xf] %v4_v0  ;;  %s179_s11 = smov 126   ;;  %s180_s12 = smov 122  }
   0x3   :  { %s181_s13 = smov 120   ;;  %s182_s14 = smov 121  }
   0x4   :  { %s183_s15 = smov 119   ;;  %s184_s16 = smov 117  }
   0x5   :  { %s185_s17 = smov 118   ;;  %s186_s18 = smov 116  }
   0x6   :  { %s187_s19 = smov 114   ;;  %s188_s20 = smov 115  }
   0x7   :  { %s189_s21 = smov 113  }
   0x9   :  { %v26_v1 = vld [vmem:[#allocation0] sm:$0xf]  }
   0xa   :  { %v10_v2 = vld [vmem:[#allocation0] sm:$0xf]   ;;  %27 = vrot.lane.b32.xlu1 %v26_v1, %s175_s0 }
   0xb   :  { %11 = vrot.lane.b32.xlu0 %v10_v2, %s176_s8  ;;  %v42_v3 = vld [vmem:[#allocation0] sm:$0xf]  }
   0xc   :  { %43 = vrot.lane.b32.xlu2 %v42_v3, %s177_s9  ;;  %v34_v4 = vld [vmem:[#allocation0] sm:$0xf]  }
   0xd   :  { %v18_v5 = vld [vmem:[#allocation0] sm:$0xf]  }
   0xe   :  { %v50_v6 = vld [vmem:[#allocation0] sm:$0xf]  }
   0xf   :  { %v66_v7 = vld [vmem:[#allocation0] sm:$0xf]  }
  0x10   :  { %v58_v8 = vld [vmem:[#allocation0] sm:$0xf]  }
  0x11   :  { %v74_v9 = vld [vmem:[#allocation0] sm:$0xf]  }
  0x12   :  { %35 = vrot.lane.b32.xlu1 %v34_v4, %s178_s10  ;;  %v90_v10 = vld [vmem:[#allocation0] sm:$0xf]  }
  0x13   :  { %19 = vrot.lane.b32.xlu0 %v18_v5, %s179_s11  ;;  %v82_v11 = vld [vmem:[#allocation0] sm:$0xf]  }
  0x14   :  { %51 = vrot.lane.b32.xlu2 %v50_v6, %s180_s12  ;;  %v98_v12 = vld [vmem:[#allocation0] sm:$0xf]  }
  0x15   :  { %v114_v13 = vld [vmem:[#allocation0] sm:$0xf]  }
  0x16   :  { %v106_v14 = vld [vmem:[#allocation0] sm:$0xf]  }
  0x17   :  { %v122_v15 = vld [vmem:[#allocation0] sm:$0xf]  }
  0x18   :  { %v6_v22 = vld [vmem:[#allocation0] sm:$0xf]  }
  0x19   :  { %8 = vst.msk [vmem:[%s332_s1] ss:$16 sm:$0x3] %vm7_vm0, %v6_v22  }
  0x1a   :  { %67 = vrot.lane.b32.xlu1 %v66_v7, %s181_s13  ;;  %9 = vst.msk [vmem:[%s332_s1] ss:$16 sm:$0xc] %vm7_vm0, %v6_v22  }
  0x1b   :  { %59 = vrot.lane.b32.xlu0 %v58_v8, %s182_s14 }
  0x1c   :  { %75 = vrot.lane.b32.xlu2 %v74_v9, %s183_s15 }
  0x22   :  { %91 = vrot.lane.b32.xlu1 %v90_v10, %s184_s16 }
  0x23   :  { %83 = vrot.lane.b32.xlu0 %v82_v11, %s185_s17 }
  0x24   :  { %99 = vrot.lane.b32.xlu2 %v98_v12, %s186_s18 }
  0x2a   :  { %115 = vrot.lane.b32.xlu1 %v114_v13, %s187_s19 }
  0x2b   :  { %107 = vrot.lane.b32.xlu0 %v106_v14, %s188_s20 }
  0x2c   :  { %123 = vrot.lane.b32.xlu2 %v122_v15, %s189_s21 }
  0x66   :  { %v44_v16 = vpop.permute.xlu2 %43  }
  0x67   :  { %138 = vst.msk [vmem:[%s332_s1 + $0x5] ss:$16 sm:$0x3] %vm7_vm0, %v44_v16  }
  0x68   :  { %139 = vst.msk [vmem:[%s332_s1 + $0x5] ss:$16 sm:$0xc] %vm7_vm0, %v44_v16  }
  0x6e   :  { %v52_v17 = vpop.permute.xlu2 %51  }
  0x6f   :  { %140 = vst.msk [vmem:[%s332_s1 + $0x6] ss:$16 sm:$0x3] %vm7_vm0, %v52_v17  }
  0x70   :  { %141 = vst.msk [vmem:[%s332_s1 + $0x6] ss:$16 sm:$0xc] %vm7_vm0, %v52_v17  }
  0x76   :  { %v76_v18 = vpop.permute.xlu2 %75  }
  0x77   :  { %146 = vst.msk [vmem:[%s332_s1 + $0x9] ss:$16 sm:$0x3] %vm7_vm0, %v76_v18  }
  0x78   :  { %147 = vst.msk [vmem:[%s332_s1 + $0x9] ss:$16 sm:$0xc] %vm7_vm0, %v76_v18  }
  0x7c   :  { %v28_v19 = vpop.permute.xlu1 %27  }
  0x7d   :  { %v12_v20 = vpop.permute.xlu0 %11   ;;  %134 = vst.msk [vmem:[%s332_s1 + $0x3] ss:$16 sm:$0x3] %vm7_vm0, %v28_v19  }
  0x7e   :  { %135 = vst.msk [vmem:[%s332_s1 + $0x3] ss:$16 sm:$0xc] %vm7_vm0, %v28_v19   ;;  %v100_v21 = vpop.permute.xlu2 %99  }
  0x7f   :  { %130 = vst.msk [vmem:[%s332_s1 + $0x1] ss:$16 sm:$0x3] %vm7_vm0, %v12_v20  }
  0x80   :  { %131 = vst.msk [vmem:[%s332_s1 + $0x1] ss:$16 sm:$0xc] %vm7_vm0, %v12_v20  }
  0x81   :  { %152 = vst.msk [vmem:[%s332_s1 + $0xc] ss:$16 sm:$0x3] %vm7_vm0, %v100_v21  }
  0x82   :  { %153 = vst.msk [vmem:[%s332_s1 + $0xc] ss:$16 sm:$0xc] %vm7_vm0, %v100_v21  }
  0x84   :  { %v36_v23 = vpop.permute.xlu1 %35  }
  0x85   :  { %v20_v24 = vpop.permute.xlu0 %19   ;;  %136 = vst.msk [vmem:[%s332_s1 + $0x4] ss:$16 sm:$0x3] %vm7_vm0, %v36_v23  }
  0x86   :  { %137 = vst.msk [vmem:[%s332_s1 + $0x4] ss:$16 sm:$0xc] %vm7_vm0, %v36_v23   ;;  %v124_v25 = vpop.permute.xlu2 %123  }
  0x87   :  { %132 = vst.msk [vmem:[%s332_s1 + $0x2] ss:$16 sm:$0x3] %vm7_vm0, %v20_v24  }
  0x88   :  { %133 = vst.msk [vmem:[%s332_s1 + $0x2] ss:$16 sm:$0xc] %vm7_vm0, %v20_v24  }
  0x89   :  { %158 = vst.msk [vmem:[%s332_s1 + $0xf] ss:$16 sm:$0x3] %vm7_vm0, %v124_v25  }
  0x8a   :  { %159 = vst.msk [vmem:[%s332_s1 + $0xf] ss:$16 sm:$0xc] %vm7_vm0, %v124_v25  }
  0x8c   :  { %v68_v26 = vpop.permute.xlu1 %67  }
  0x8d   :  { %v60_v27 = vpop.permute.xlu0 %59   ;;  %144 = vst.msk [vmem:[%s332_s1 + $0x8] ss:$16 sm:$0x3] %vm7_vm0, %v68_v26  }
  0x8e   :  { %145 = vst.msk [vmem:[%s332_s1 + $0x8] ss:$16 sm:$0xc] %vm7_vm0, %v68_v26  }
  0x8f   :  { %142 = vst.msk [vmem:[%s332_s1 + $0x7] ss:$16 sm:$0x3] %vm7_vm0, %v60_v27  }
  0x90   :  { %143 = vst.msk [vmem:[%s332_s1 + $0x7] ss:$16 sm:$0xc] %vm7_vm0, %v60_v27  }
  0x94   :  { %v92_v28 = vpop.permute.xlu1 %91  }
  0x95   :  { %v84_v29 = vpop.permute.xlu0 %83   ;;  %150 = vst.msk [vmem:[%s332_s1 + $0xb] ss:$16 sm:$0x3] %vm7_vm0, %v92_v28  }
  0x96   :  { %151 = vst.msk [vmem:[%s332_s1 + $0xb] ss:$16 sm:$0xc] %vm7_vm0, %v92_v28  }
  0x97   :  { %148 = vst.msk [vmem:[%s332_s1 + $0xa] ss:$16 sm:$0x3] %vm7_vm0, %v84_v29  }
  0x98   :  { %149 = vst.msk [vmem:[%s332_s1 + $0xa] ss:$16 sm:$0xc] %vm7_vm0, %v84_v29  }
  0x9c   :  { %v116_v30 = vpop.permute.xlu1 %115  }
  0x9d   :  { %v108_v31 = vpop.permute.xlu0 %107   ;;  %156 = vst.msk [vmem:[%s332_s1 + $0xe] ss:$16 sm:$0x3] %vm7_vm0, %v116_v30  }
  0x9e   :  { %157 = vst.msk [vmem:[%s332_s1 + $0xe] ss:$16 sm:$0xc] %vm7_vm0, %v116_v30  }
  0x9f   :  { %154 = vst.msk [vmem:[%s332_s1 + $0xd] ss:$16 sm:$0x3] %vm7_vm0, %v108_v31  }
  0xa0   :  { %155 = vst.msk [vmem:[%s332_s1 + $0xd] ss:$16 sm:$0xc] %vm7_vm0, %v108_v31  }

// kernel: _decoder_forward.4
= control target key start
LH: loop header
LB: loop body
LE: loop exit
PB: predicated region body
PF: predicated region fallthrough
CT: control target
= control target key end

     0   :  { %vm355_vm0 = vcmask 261120   ;;  %vm566_vm1 = vcmask 1043456   ;;  %vm567_vm2 = vcmask 261124   ;;  %s1275_s0 = inlined_call_operand.vmem [shape: bf16[1,288,160], index: 0, kind: input, shape index: {}]   ;;  %s1276_s1 = inlined_call_operand.vmem [shape: bf16[64,288], index: 1, kind: input, shape index: {}]   ;;  %s1277_s2 = inlined_call_operand.vmem [shape: f32[64,1], index: 2, kind: input, shape index: {}]   ;;  %s1278_s3 = inlined_call_operand.vmem [shape: bf16[1,64,160], index: 3, kind: output, shape index: {}]  }
   0x1   :  { %v687_v0 = vld [vmem:[%s1275_s0 + $0x70] sm:$0xf]  ;;  %v808_v1 = vld [vmem:[%s1275_s0 + $0x74] sm:$0xf0]  ;;  %v679_v5 = vld [vmem:[%s1275_s0 + $0x60] sm:$0xf] }
   0x2   :  { %v767_v2 = vld [vmem:[%s1275_s0 + $0x110] sm:$0xf]  ;;  %v688_v3 = vor.u32 %v808_v1, %v687_v0  ;;  %v828_v4 = vld [vmem:[%s1275_s0 + $0x114] sm:$0xf0]  ;;  %v806_v6 = vld [vmem:[%s1275_s0 + $0x64] sm:$0xf0] }
   0x3   :  { %v768_v7 = vor.u32 %v828_v4, %v767_v2  ;;  %v759_v8 = vld [vmem:[%s1275_s0 + $0x100] sm:$0xf]  ;;  %v826_v9 = vld [vmem:[%s1275_s0 + $0x104] sm:$0xf0]  ;;  %v615_v10 = vld [vmem:[%s1276_s1 + $0x38] sm:$0xf]  ;;  %v680_v11 = vor.u32 %v806_v6, %v679_v5 }
   0x4   :  { %368 = vmatpush.bf16.msra.mxu0 %v688_v3  ;;  %829 = vmatpush.bf16.msra.mxu1 %v688_v3  ;;  %v789_v12 = vld [vmem:[%s1276_s1 + $0x40] sm:$0xf0]  ;;  %v671_v13 = vld [vmem:[%s1275_s0 + $0x50] sm:$0xf]  ;;  %v804_v14 = vld [vmem:[%s1275_s0 + $0x54] sm:$0xf0]  ;;  %v760_v15 = vor.u32 %v826_v9, %v759_v8 }
   0x5   :  { %837 = vmatpush.bf16.msra.mxu3 %v768_v7  ;;  %432 = vmatpush.bf16.msra.mxu2 %v768_v7  ;;  %v807_v16 = vld [vmem:[%s1275_s0 + $0x74] sm:$0xf]  ;;  %v689_v17 = vld [vmem:[%s1275_s0 + $0x78] sm:$0xf0]  ;;  %v591_v18 = vld [vmem:[%s1276_s1 + $0x8] sm:$0xf]  ;;  %v921_v25 = vor.u32 %v789_v12, %v615_v10  ;;  %v672_v26 = vor.u32 %v804_v14, %v671_v13 }
   0x6   :  { %v692_v19 = vor.u32 %v807_v16, %v689_v17  ;;  %v783_v20 = vld [vmem:[%s1276_s1 + $0x10] sm:$0xf0]  ;;  %v753_v22 = vld [vmem:[%s1275_s0 + $0xf8] sm:$0xf0]  ;;  %v805_v24 = vld [vmem:[%s1275_s0 + $0x64] sm:$0xf] }
   0x7   :  { %v823_v21 = vld [vmem:[%s1275_s0 + $0xf4] sm:$0xf]  ;;  %v681_v27 = vld [vmem:[%s1275_s0 + $0x68] sm:$0xf0]  ;;  %v821_v28 = vld [vmem:[%s1275_s0 + $0xe4] sm:$0xf]  ;;  %v932_v30 = vor.u32 %v783_v20, %v591_v18 }
   0x8   :  { %v756_v23 = vor.u32 %v823_v21, %v753_v22  ;;  %369 = vmatpush.bf16.msra.mxu0 %v680_v11  ;;  %830 = vmatpush.bf16.msra.mxu1 %v680_v11  ;;  %v745_v29 = vld [vmem:[%s1275_s0 + $0xe8] sm:$0xf0]  ;;  %v663_v31 = vld [vmem:[%s1275_s0 + $0x40] sm:$0xf]  ;;  %v802_v32 = vld [vmem:[%s1275_s0 + $0x44] sm:$0xf0]  ;;  %v684_v33 = vor.u32 %v805_v24, %v681_v27 }
   0x9   :  { %838 = vmatpush.bf16.msra.mxu3 %v760_v15  ;;  %433 = vmatpush.bf16.msra.mxu2 %v760_v15  ;;  %v748_v34 = vor.u32 %v821_v28, %v745_v29  ;;  %v803_v35 = vld [vmem:[%s1275_s0 + $0x54] sm:$0xf]  ;;  %v673_v36 = vld [vmem:[%s1275_s0 + $0x58] sm:$0xf0]  ;;  %v664_v39 = vor.u32 %v802_v32, %v663_v31  ;;  %v655_v40 = vld [vmem:[%s1275_s0 + $0x30] sm:$0xf] }
   0xa   :  { %v819_v37 = vld [vmem:[%s1275_s0 + $0xd4] sm:$0xf]  ;;  %v737_v38 = vld [vmem:[%s1275_s0 + $0xd8] sm:$0xf0]  ;;  %v800_v41 = vld [vmem:[%s1275_s0 + $0x34] sm:$0xf0]  ;;  %v676_v42 = vor.u32 %v803_v35, %v673_v36 }
   0xb   :  { %v740_v43 = vor.u32 %v819_v37, %v737_v38  ;;  %v801_v44 = vld [vmem:[%s1275_s0 + $0x44] sm:$0xf]  ;;  %v665_v45 = vld [vmem:[%s1275_s0 + $0x48] sm:$0xf0]  ;;  %v656_v48 = vor.u32 %v800_v41, %v655_v40  ;;  %v647_v49 = vld [vmem:[%s1275_s0 + $0x20] sm:$0xf] }
   0xc   :  { %775 = vmatmul.msk.bf16.vlgmr.msra.gmra.mxu3 %vm355_vm0, %v921_v25  ;;  %370 = vmatpush.bf16.msra.mxu0 %v672_v26  ;;  %v817_v46 = vld [vmem:[%s1275_s0 + $0xc4] sm:$0xf]  ;;  %v729_v47 = vld [vmem:[%s1275_s0 + $0xc8] sm:$0xf0]  ;;  %v798_v50 = vld [vmem:[%s1275_s0 + $0x24] sm:$0xf0]  ;;  %v668_v51 = vor.u32 %v801_v44, %v665_v45 }
   0xd   :  { %455 = vmatpush.bf16.msrb.mxu3 %v692_v19  ;;  %484 = vmatpush.bf16.msrb.mxu2 %v756_v23  ;;  %v732_v52 = vor.u32 %v817_v46, %v729_v47  ;;  %v799_v53 = vld [vmem:[%s1275_s0 + $0x34] sm:$0xf]  ;;  %v657_v54 = vld [vmem:[%s1275_s0 + $0x38] sm:$0xf0]  ;;  %v648_v57 = vor.u32 %v798_v50, %v647_v49  ;;  %v627_v58 = vld [vmem:[%s1276_s1 + $0x50] sm:$0xf] }
   0xe   :  { %831 = vmatpush.bf16.msra.mxu1 %v672_v26  ;;  %773 = vmatmul.msk.bf16.vlgmr.msra.gmra.mxu2 %vm355_vm0, %v932_v30  ;;  %v815_v55 = vld [vmem:[%s1275_s0 + $0xb4] sm:$0xf]  ;;  %v721_v56 = vld [vmem:[%s1275_s0 + $0xb8] sm:$0xf0]  ;;  %v639_v60 = vld [vmem:[%s1275_s0 + $0x10] sm:$0xf]  ;;  %v660_v62 = vor.u32 %v799_v53, %v657_v54 }
   0xf   :  { %v792_v59 = vld [vmem:[%s1276_s1 + $0x58] sm:$0xf0]  ;;  %v796_v61 = vld [vmem:[%s1275_s0 + $0x14] sm:$0xf0]  ;;  %v603_v63 = vld [vmem:[%s1276_s1 + $0x20] sm:$0xf]  ;;  %v724_v1 = vor.u32 %v815_v55, %v721_v56 }
  0x10   :  { %371 = vmatpush.bf16.msra.mxu0 %v664_v39  ;;  %v786_v0 = vld [vmem:[%s1276_s1 + $0x28] sm:$0xf0]  ;;  %v797_v2 = vld [vmem:[%s1275_s0 + $0x24] sm:$0xf]  ;;  %v1022_v6 = vor.u32 %v792_v59, %v627_v58  ;;  %v640_v7 = vor.u32 %v796_v61, %v639_v60  ;;  %v631_v9 = vld [vmem:[%s1275_s0] sm:$0xf] }
  0x11   :  { %456 = vmatpush.bf16.msrb.mxu3 %v684_v33  ;;  %485 = vmatpush.bf16.msrb.mxu2 %v748_v34  ;;  %v649_v3 = vld [vmem:[%s1275_s0 + $0x28] sm:$0xf0]  ;;  %v813_v4 = vld [vmem:[%s1275_s0 + $0xa4] sm:$0xf]  ;;  %v1024_v8 = vor.u32 %v786_v0, %v603_v63  ;;  %v794_v10 = vld [vmem:[%s1275_s0 + $0x4] sm:$0xf0] }
  0x12   :  { %832 = vmatpush.bf16.msra.mxu1 %v664_v39  ;;  %v713_v5 = vld [vmem:[%s1275_s0 + $0xa8] sm:$0xf0]  ;;  %v652_v11 = vor.u32 %v797_v2, %v649_v3  ;;  %v583_v13 = vld [vmem:[%s1276_s1] sm:$0xf]  ;;  %v751_v15 = vld [vmem:[%s1275_s0 + $0xf0] sm:$0xf]  ;;  %v632_v22 = vor.u32 %v794_v10, %v631_v9 }
  0x13   :  { %v716_v12 = vor.u32 %v813_v4, %v713_v5  ;;  %v782_v14 = vld [vmem:[%s1276_s1 + $0x8] sm:$0xf0]  ;;  %v827_v16 = vld [vmem:[%s1275_s0 + $0x114] sm:$0xf]  ;;  %v769_v17 = vld [vmem:[%s1275_s0 + $0x118] sm:$0xf0] }
  0x14   :  { %372 = vmatpush.bf16.msra.mxu0 %v656_v48  ;;  %v824_v18 = vld [vmem:[%s1275_s0 + $0xf4] sm:$0xf0]  ;;  %v795_v19 = vld [vmem:[%s1275_s0 + $0x14] sm:$0xf]  ;;  %v641_v20 = vld [vmem:[%s1275_s0 + $0x18] sm:$0xf0]  ;;  %v772_v29 = vor.u32 %v827_v16, %v769_v17  ;;  %v584_v37 = vor.u32 %v782_v14, %v583_v13 }
  0x15   :  { %457 = vmatpush.bf16.msrb.mxu3 %v676_v42  ;;  %486 = vmatpush.bf16.msrb.mxu2 %v740_v43  ;;  %v843_v21 = vmov 0   ;;  %v811_v23 = vld [vmem:[%s1275_s0 + $0x94] sm:$0xf]  ;;  %v705_v24 = vld [vmem:[%s1275_s0 + $0x98] sm:$0xf0]  ;;  %v67_v26 = vld [vmem:[%s1277_s2] sm:$0xff]  ;;  %v752_v32 = vor.u32 %v824_v18, %v751_v15  ;;  %v644_v33 = vor.u32 %v795_v19, %v641_v20 }
  0x16   :  { %833 = vmatpush.bf16.msra.mxu1 %v656_v48  ;;  %840 = vset.pattern.permute.xlu0 %v843_v21  ;;  %v607_v27 = vld [vmem:[%s1276_s1 + $0x30] sm:$0xf]  ;;  %v788_v28 = vld [vmem:[%s1276_s1 + $0x38] sm:$0xf0]  ;;  %v743_v34 = vld [vmem:[%s1275_s0 + $0xe0] sm:$0xf]  ;;  %v708_v38 = vor.u32 %v811_v23, %v705_v24 }
  0x17   :  { %841 = vset.pattern.permute.xlu1 %v843_v21  ;;  %v69_v31 = vld [vmem:[%s1277_s2 + $0x10] sm:$0xff]  ;;  %v825_v35 = vld [vmem:[%s1275_s0 + $0x104] sm:$0xf]  ;;  %v761_v36 = vld [vmem:[%s1275_s0 + $0x108] sm:$0xf0]  ;;  %77 = vperm.xlu0 %840, %v67_v26   ;;  %v1096_v42 = vor.u32 %v788_v28, %v607_v27 }
  0x18   :  { %373 = vmatpush.bf16.msra.mxu0 %v648_v57  ;;  %v822_v39 = vld [vmem:[%s1275_s0 + $0xe4] sm:$0xf0]  ;;  %v793_v40 = vld [vmem:[%s1275_s0 + $0x4] sm:$0xf]  ;;  %v633_v41 = vld [vmem:[%s1275_s0 + $0x8] sm:$0xf0]  ;;  %87 = vperm.xlu1 %841, %v69_v31   ;;  %v764_v45 = vor.u32 %v825_v35, %v761_v36 }
  0x19   :  { %458 = vmatpush.bf16.msrb.mxu3 %v668_v51  ;;  %487 = vmatpush.bf16.msrb.mxu2 %v732_v52  ;;  %v809_v43 = vld [vmem:[%s1275_s0 + $0x84] sm:$0xf]  ;;  %v697_v44 = vld [vmem:[%s1275_s0 + $0x88] sm:$0xf0]  ;;  %v744_v46 = vor.u32 %v822_v39, %v743_v34  ;;  %v636_v47 = vor.u32 %v793_v40, %v633_v41  ;;  %v735_v49 = vld [vmem:[%s1275_s0 + $0xd0] sm:$0xf] }
  0x1a   :  { %834 = vmatpush.bf16.msra.mxu1 %v648_v57  ;;  %842 = vset.pattern.permute.xlu2 %v843_v21  ;;  %v700_v48 = vor.u32 %v809_v43, %v697_v44  ;;  %v820_v50 = vld [vmem:[%s1275_s0 + $0xd4] sm:$0xf0]  ;;  %v68_v51 = vld [vmem:[%s1277_s2 + $0x8] sm:$0xff]  ;;  %v71_v52 = vld [vmem:[%s1277_s2 + $0x20] sm:$0xff] }
  0x1b   :  { %v70_v53 = vld [vmem:[%s1277_s2 + $0x18] sm:$0xff]  ;;  %97 = vperm.xlu2 %842, %v71_v52   ;;  %v736_v54 = vor.u32 %v820_v50, %v735_v49  ;;  %v781_v55 = vld [vmem:[%s1276_s1 + $0x4] sm:$0xf]  ;;  %v585_v56 = vld [vmem:[%s1276_s1 + $0xc] sm:$0xf0] }
  0x1c   :  { %776 = vmatmul.msk.bf16.gmra.mxu3 %vm355_vm0, %v1022_v6  ;;  %374 = vmatpush.bf16.msra.mxu0 %v640_v7  ;;  %v727_v57 = vld [vmem:[%s1275_s0 + $0xc0] sm:$0xf]  ;;  %v818_v58 = vld [vmem:[%s1275_s0 + $0xc4] sm:$0xf0]  ;;  %v588_v59 = vor.u32 %v781_v55, %v585_v56  ;;  %v595_v61 = vld [vmem:[%s1276_s1 + $0x18] sm:$0xf] }
  0x1d   :  { %459 = vmatpush.bf16.msrb.mxu3 %v660_v62  ;;  %488 = vmatpush.bf16.msrb.mxu2 %v724_v1  ;;  %v728_v60 = vor.u32 %v818_v58, %v727_v57  ;;  %v719_v62 = vld [vmem:[%s1275_s0 + $0xb0] sm:$0xf]  ;;  %v816_v63 = vld [vmem:[%s1275_s0 + $0xb4] sm:$0xf0]  ;;  %v785_v0 = vld [vmem:[%s1276_s1 + $0x20] sm:$0xf0] }
  0x1e   :  { %835 = vmatpush.bf16.msra.mxu1 %v640_v7  ;;  %774 = vmatmul.msk.bf16.gmra.mxu2 %vm355_vm0, %v1024_v8  ;;  %v619_v1 = vld [vmem:[%s1276_s1 + $0x48] sm:$0xf]  ;;  %v73_v2 = vld [vmem:[%s1277_s2 + $0x30] sm:$0xff]  ;;  %v74_v4 = vld [vmem:[%s1277_s2 + $0x38] sm:$0xff]  ;;  %v720_v7 = vor.u32 %v816_v63, %v719_v62  ;;  %v596_v9 = vor.u32 %v785_v0, %v595_v61 }
  0x1f   :  { %82 = vperm.xlu0 %840, %v68_v51   ;;  %v791_v3 = vld [vmem:[%s1276_s1 + $0x50] sm:$0xf0]  ;;  %v72_v5 = vld [vmem:[%s1277_s2 + $0x28] sm:$0xff]  ;;  %v711_v10 = vld [vmem:[%s1275_s0 + $0xa0] sm:$0xf] }
  0x20   :  { %375 = vmatpush.bf16.msra.mxu0 %v632_v22  ;;  %92 = vperm.xlu1 %841, %v70_v53   ;;  %v703_v14 = vld [vmem:[%s1275_s0 + $0x90] sm:$0xf]  ;;  %v812_v15 = vld [vmem:[%s1275_s0 + $0x94] sm:$0xf0]  ;;  %v784_v17 = vld [vmem:[%s1276_s1 + $0x1c] sm:$0xf] }
  0x21   :  { %460 = vmatpush.bf16.msrb.mxu3 %v652_v11  ;;  %489 = vmatpush.bf16.msrb.mxu2 %v716_v12  ;;  %v814_v11 = vld [vmem:[%s1275_s0 + $0xa4] sm:$0xf0]  ;;  %v620_v12 = vor.u32 %v791_v3, %v619_v1  ;;  %v704_v16 = vor.u32 %v812_v15, %v703_v14  ;;  %v695_v19 = vld [vmem:[%s1275_s0 + $0x80] sm:$0xf]  ;;  %v787_v23 = vld [vmem:[%s1276_s1 + $0x34] sm:$0xf] }
  0x22   :  { %836 = vmatpush.bf16.msra.mxu1 %v632_v22  ;;  %v712_v13 = vor.u32 %v814_v11, %v711_v10  ;;  %v597_v18 = vld [vmem:[%s1276_s1 + $0x24] sm:$0xf0]  ;;  %v609_v24 = vld [vmem:[%s1276_s1 + $0x3c] sm:$0xf0]  ;;  %v621_v27 = vld [vmem:[%s1276_s1 + $0x54] sm:$0xf0] }
  0x23   :  { %376 = vmatmul.bf16.vlgmr.msra.gmra.mxu0 %v584_v37  ;;  %102 = vperm.xlu2 %842, %v72_v5   ;;  %v810_v20 = vld [vmem:[%s1275_s0 + $0x84] sm:$0xf0]  ;;  %v600_v21 = vor.u32 %v784_v17, %v597_v18  ;;  %v612_v26 = vor.u32 %v787_v23, %v609_v24  ;;  %vm1222_vm3 = vmor %vm567_vm2, %vm566_vm1 }
  0x24   :  { %519 = vmatpush.bf16.msrb.mxu0 %v772_v29  ;;  %v696_v22 = vor.u32 %v810_v20, %v695_v19 }
  0x25   :  { %461 = vmatpush.bf16.msrb.mxu3 %v644_v33  ;;  %490 = vmatpush.bf16.msrb.mxu2 %v708_v38 }
  0x26   :  { %397 = vmatpush.bf16.msrb.mxu1 %v752_v32 }
  0x27   :  { %386 = vmatmul.bf16.vlgmr.msra.gmra.mxu1 %v1096_v42  ;;  %107 = vperm.xlu0 %840, %v73_v2  }
  0x28   :  { %520 = vmatpush.bf16.msrb.mxu0 %v764_v45  ;;  %112 = vperm.xlu1 %841, %v74_v4  }
  0x29   :  { %462 = vmatpush.bf16.msrb.mxu3 %v636_v47  ;;  %491 = vmatpush.bf16.msrb.mxu2 %v700_v48 }
  0x2a   :  { %398 = vmatpush.bf16.msrb.mxu1 %v744_v46 }
  0x2c   :  { %463 = vmatmul.bf16.vlgmr.msrb.gmra.mxu3 %v584_v37 }
  0x2e   :  { %399 = vmatpush.bf16.msrb.mxu1 %v736_v54  ;;  %492 = vmatmul.bf16.vlgmr.msrb.gmra.mxu2 %v588_v59 }
  0x32   :  { %400 = vmatpush.bf16.msrb.mxu1 %v728_v60 }
  0x33   :  { %381 = vmatmul.bf16.gmra.mxu0 %v596_v9 }
  0x36   :  { %401 = vmatpush.bf16.msrb.mxu1 %v720_v7 }
  0x37   :  { %391 = vmatmul.bf16.gmra.mxu1 %v620_v12 }
  0x3a   :  { %402 = vmatpush.bf16.msrb.mxu1 %v712_v13 }
  0x3c   :  { %468 = vmatmul.bf16.gmra.mxu3 %v596_v9 }
  0x3e   :  { %403 = vmatpush.bf16.msrb.mxu1 %v704_v16  ;;  %497 = vmatmul.bf16.gmra.mxu2 %v600_v21 }
  0x42   :  { %404 = vmatpush.bf16.msrb.mxu1 %v696_v22 }
  0x43   :  { %777 = vmatmul.msk.bf16.vlgmr.msrb.gmra.mxu0 %vm355_vm0, %v932_v30  ;;  %v790_v30 = vld [vmem:[%s1276_s1 + $0x4c] sm:$0xf] }
  0x44   :  { %v624_v28 = vor.u32 %v790_v30, %v621_v27 }
  0x47   :  { %405 = vmatmul.bf16.vlgmr.msrb.gmra.mxu1 %v588_v59 }
  0x4c   :  { %473 = vmatmul.bf16.gmra.mxu3 %v1096_v42 }
  0x4e   :  { %502 = vmatmul.bf16.gmra.mxu2 %v612_v26 }
  0x53   :  { %778 = vmatmul.msk.bf16.gmra.mxu0 %vm355_vm0, %v1024_v8 }
  0x57   :  { %410 = vmatmul.bf16.gmra.mxu1 %v600_v21 }
  0x5c   :  { %478 = vmatmul.bf16.gmra.mxu3 %v620_v12 }
  0x5e   :  { %507 = vmatmul.bf16.gmra.mxu2 %v624_v28 }
  0x63   :  { %779 = vmatmul.msk.bf16.gmra.mxu0 %vm355_vm0, %v921_v25 }
  0x67   :  { %415 = vmatmul.bf16.gmra.mxu1 %v612_v26 }
  0x73   :  { %780 = vmatmul.msk.bf16.gmra.mxu0 %vm355_vm0, %v1022_v6 }
  0x77   :  { %420 = vmatmul.bf16.gmra.mxu1 %v624_v28 }
  0x89   :  { %v78_v44 = vpop.permute.xlu0 %77 }
  0x8a   :  { %v88_v63 = vpop.permute.xlu1 %87 }
  0x8f   :  { %v1204_v8 = vpop.f32.mrf.mxu3 }
  0x91   :  { %v435_v29 = vpop.f32.mrf.mxu2  ;;  %v83_v56 = vpop.permute.xlu0 %82 }
  0x92   :  { %v93_v22 = vpop.permute.xlu1 %92 }
  0x97   :  { %v1206_v31 = vpop.f32.mrf.mxu3 }
  0x99   :  { %v437_v32 = vpop.f32.mrf.mxu2 }
  0x9f   :  { %v1208_v33 = vpop.f32.mrf.mxu3 }
  0xa0   :  { %v377_v34 = vpop.f32.mrf.mxu0 }
  0xa1   :  { %v440_v35 = vpop.f32.mrf.mxu2  ;;  %v378_v51 = vadd.f32 %v377_v34, %v78_v44 }
  0xa4   :  { %v1210_v36 = vpop.f32.mrf.mxu1 }
  0xa7   :  { %v1212_v37 = vpop.f32.mrf.mxu3 }
  0xa8   :  { %v379_v25 = vpop.f32.mrf.mxu0 }
  0xa9   :  { %v1214_v38 = vpop.f32.mrf.mxu2  ;;  %v380_v0 = vadd.f32 %v379_v25, %v83_v56 }
  0xac   :  { %v1216_v39 = vpop.f32.mrf.mxu1 }
  0xaf   :  { %v464_v6 = vpop.f32.mrf.mxu3 }
  0xb0   :  { %v382_v40 = vpop.f32.mrf.mxu0  ;;  %v465_v46 = vadd.f32 %v464_v6, %v78_v44 }
  0xb1   :  { %v493_v41 = vpop.f32.mrf.mxu2  ;;  %v383_v16 = vadd.f32 %v382_v40, %v88_v63 }
  0xb2   :  { %v494_v49 = vadd.f32 %v493_v41, %v465_v46 }
  0xb4   :  { %v1218_v42 = vpop.f32.mrf.mxu1 }
  0xb7   :  { %v466_v43 = vpop.f32.mrf.mxu3 }
  0xb8   :  { %v384_v45 = vpop.f32.mrf.mxu0  ;;  %v467_v58 = vadd.f32 %v466_v43, %v83_v56 }
  0xb9   :  { %v495_v48 = vpop.f32.mrf.mxu2 }
  0xba   :  { %v496_v1 = vadd.f32 %v495_v48, %v467_v58 }
  0xbc   :  { %v1220_v47 = vpop.f32.mrf.mxu1 }
  0xbf   :  { %v469_v50 = vpop.f32.mrf.mxu3 }
  0xc0   :  { %v522_v52 = vpop.f32.mrf.mxu0  ;;  %v470_v4 = vadd.f32 %v469_v50, %v88_v63 }
  0xc1   :  { %v523_v54 = vadd.f32 %v522_v52, %v494_v49  ;;  %v498_v57 = vpop.f32.mrf.mxu2 }
  0xc2   :  { %v499_v12 = vadd.f32 %v498_v57, %v470_v4 }
  0xc3   :  { %v543_v60 = vmax.f32 %v523_v54, 0.0 }
  0xc4   :  { %v406_v53 = vpop.f32.mrf.mxu1 }
  0xc5   :  { %v407_v55 = vadd.f32 %v406_v53, %v378_v51 }
  0xc7   :  { %v436_v59 = vadd.f32 %v435_v29, %v407_v55  ;;  %v471_v5 = vpop.f32.mrf.mxu3  ;;  %v98_v29 = vpop.permute.xlu2 %97 }
  0xc8   :  { %v524_v3 = vpop.f32.mrf.mxu0  ;;  %v472_v24 = vadd.f32 %v471_v5, %v93_v22  ;;  %v108_v5 = vpop.permute.xlu0 %107 }
  0xc9   :  { %v542_v61 = vmax.f32 %v436_v59, 0.0  ;;  %v525_v10 = vadd.f32 %v524_v3, %v496_v1  ;;  %v500_v13 = vpop.f32.mrf.mxu2 }
  0xca   :  { %v501_v34 = vadd.f32 %v500_v13, %v472_v24 }
  0xcb   :  { %v558_v2 = vpack.c.bf16 %v543_v60, %v542_v61  ;;  %v545_v15 = vmax.f32 %v525_v10, 0.0 }
  0xcc   :  { %v408_v7 = vpop.f32.mrf.mxu1 }
  0xcd   :  { %569 = vst.msk [vmem:[%s1278_s3] sm:$0xff] %vm1222_vm3, %v558_v2  ;;  %v409_v9 = vadd.f32 %v408_v7, %v380_v0 }
  0xcf   :  { %v438_v11 = vadd.f32 %v437_v32, %v409_v9  ;;  %v474_v23 = vpop.f32.mrf.mxu3  ;;  %v385_v32 = vadd.f32 %v384_v45, %v93_v22  ;;  %v388_v45 = vadd.f32 %v1210_v36, %v98_v29  ;;  %v103_v57 = vpop.permute.xlu2 %102 }
  0xd0   :  { %v527_v18 = vpop.f32.mrf.mxu0  ;;  %v475_v40 = vadd.f32 %v474_v23, %v98_v29  ;;  %v390_v36 = vadd.f32 %v1216_v39, %v103_v57  ;;  %v393_v39 = vadd.f32 %v1218_v42, %v108_v5 }
  0xd1   :  { %v544_v14 = vmax.f32 %v438_v11, 0.0  ;;  %v528_v20 = vadd.f32 %v527_v18, %v499_v12  ;;  %v503_v28 = vpop.f32.mrf.mxu2 }
  0xd2   :  { %v504_v46 = vadd.f32 %v503_v28, %v475_v40 }
  0xd3   :  { %v559_v17 = vpack.c.bf16 %v545_v15, %v544_v14  ;;  %v547_v30 = vmax.f32 %v528_v20, 0.0 }
  0xd4   :  { %v411_v19 = vpop.f32.mrf.mxu1 }
  0xd5   :  { %570 = vst.msk [vmem:[%s1278_s3 + $0x8] sm:$0xff] %vm1222_vm3, %v559_v17  ;;  %v412_v21 = vadd.f32 %v411_v19, %v383_v16  ;;  %v113_v19 = vpop.permute.xlu1 %112 }
  0xd6   :  { %v395_v23 = vadd.f32 %v1220_v47, %v113_v19 }
  0xd7   :  { %v441_v26 = vadd.f32 %v440_v35, %v412_v21  ;;  %v476_v48 = vpop.f32.mrf.mxu3 }
  0xd8   :  { %v529_v6 = vpop.f32.mrf.mxu0 }
  0xd9   :  { %v546_v27 = vmax.f32 %v441_v26, 0.0  ;;  %v530_v44 = vadd.f32 %v529_v6, %v501_v34  ;;  %v505_v53 = vpop.f32.mrf.mxu2 }
  0xdb   :  { %v560_v25 = vpack.c.bf16 %v547_v30, %v546_v27  ;;  %v549_v50 = vmax.f32 %v530_v44, 0.0 }
  0xdc   :  { %v413_v41 = vpop.f32.mrf.mxu1 }
  0xdd   :  { %571 = vst.msk [vmem:[%s1278_s3 + $0x10] sm:$0xff] %vm1222_vm3, %v560_v25  ;;  %v414_v43 = vadd.f32 %v413_v41, %v385_v32 }
  0xdf   :  { %v443_v35 = vadd.f32 %v1214_v38, %v414_v43  ;;  %v477_v38 = vadd.f32 %v476_v48, %v103_v57  ;;  %v479_v61 = vpop.f32.mrf.mxu3 }
  0xe0   :  { %v532_v52 = vpop.f32.mrf.mxu0 }
  0xe1   :  { %v548_v49 = vmax.f32 %v443_v35, 0.0  ;;  %v533_v55 = vadd.f32 %v532_v52, %v504_v46  ;;  %v506_v63 = vadd.f32 %v505_v53, %v477_v38  ;;  %v508_v7 = vpop.f32.mrf.mxu2 }
  0xe3   :  { %v561_v51 = vpack.c.bf16 %v549_v50, %v548_v49  ;;  %v551_v59 = vmax.f32 %v533_v55, 0.0 }
  0xe4   :  { %v416_v54 = vpop.f32.mrf.mxu1 }
  0xe5   :  { %572 = vst.msk [vmem:[%s1278_s3 + $0x18] sm:$0xff] %vm1222_vm3, %v561_v51  ;;  %v417_v56 = vadd.f32 %v416_v54, %v388_v45 }
  0xe7   :  { %v446_v58 = vadd.f32 %v1204_v8, %v417_v56  ;;  %v480_v8 = vadd.f32 %v479_v61, %v108_v5  ;;  %v481_v15 = vpop.f32.mrf.mxu3 }
  0xe8   :  { %v534_v1 = vpop.f32.mrf.mxu0  ;;  %v482_v20 = vadd.f32 %v481_v15, %v113_v19 }
  0xe9   :  { %v550_v60 = vmax.f32 %v446_v58, 0.0  ;;  %v535_v4 = vadd.f32 %v534_v1, %v506_v63  ;;  %v509_v12 = vadd.f32 %v508_v7, %v480_v8  ;;  %v510_v21 = vpop.f32.mrf.mxu2 }
  0xea   :  { %v511_v24 = vadd.f32 %v510_v21, %v482_v20 }
  0xeb   :  { %v562_v0 = vpack.c.bf16 %v551_v59, %v550_v60  ;;  %v553_v11 = vmax.f32 %v535_v4, 0.0 }
  0xec   :  { %v418_v2 = vpop.f32.mrf.mxu1 }
  0xed   :  { %573 = vst.msk [vmem:[%s1278_s3 + $0x20] sm:$0xff] %vm1222_vm3, %v562_v0  ;;  %v419_v3 = vadd.f32 %v418_v2, %v390_v36 }
  0xef   :  { %v448_v9 = vadd.f32 %v1206_v31, %v419_v3 }
  0xf0   :  { %v537_v14 = vpop.f32.mrf.mxu0 }
  0xf1   :  { %v552_v10 = vmax.f32 %v448_v9, 0.0  ;;  %v538_v18 = vadd.f32 %v537_v14, %v509_v12 }
  0xf3   :  { %v563_v13 = vpack.c.bf16 %v553_v11, %v552_v10  ;;  %v555_v42 = vmax.f32 %v538_v18, 0.0 }
  0xf4   :  { %v421_v16 = vpop.f32.mrf.mxu1 }
  0xf5   :  { %574 = vst.msk [vmem:[%s1278_s3 + $0x28] sm:$0xff] %vm1222_vm3, %v563_v13  ;;  %v422_v17 = vadd.f32 %v421_v16, %v393_v39 }
  0xf7   :  { %v451_v31 = vadd.f32 %v1208_v33, %v422_v17 }
  0xf8   :  { %v539_v30 = vpop.f32.mrf.mxu0 }
  0xf9   :  { %v554_v22 = vmax.f32 %v451_v31, 0.0  ;;  %v540_v29 = vadd.f32 %v539_v30, %v511_v24 }
  0xfb   :  { %v564_v26 = vpack.c.bf16 %v555_v42, %v554_v22  ;;  %v557_v34 = vmax.f32 %v540_v29, 0.0 }
  0xfc   :  { %v423_v27 = vpop.f32.mrf.mxu1 }
  0xfd   :  { %575 = vst.msk [vmem:[%s1278_s3 + $0x30] sm:$0xff] %vm1222_vm3, %v564_v26  ;;  %v424_v28 = vadd.f32 %v423_v27, %v395_v23 }
  0xff   :  { %v453_v32 = vadd.f32 %v1212_v37, %v424_v28 }
 0x101   :  { %v556_v33 = vmax.f32 %v453_v32, 0.0 }
 0x103   :  { %v565_v25 = vpack.c.bf16 %v557_v34, %v556_v33 }
 0x105   :  { %576 = vst.msk [vmem:[%s1278_s3 + $0x38] sm:$0xff] %vm1222_vm3, %v565_v25 }

// kernel: _decoder_forward.5
= control target key start
LH: loop header
LB: loop body
LE: loop exit
PB: predicated region body
PF: predicated region fallthrough
CT: control target
= control target key end

     0   :  { %s983_s12 = smov 0   ;;  %s985_s13 = smov 0   ;;  %s1137_s0 = inlined_call_operand.vmem [shape: bf16[2,144,288], index: 0, kind: input, shape index: {}]   ;;  %s1138_s1 = inlined_call_operand.vmem [shape: bf16[32,144], index: 1, kind: input, shape index: {}]   ;;  %s1139_s2 = inlined_call_operand.vmem [shape: f32[32,1], index: 2, kind: input, shape index: {}]   ;;  %s1140_s3 = inlined_call_operand.vmem [shape: bf16[2,32,288], index: 3, kind: output, shape index: {}]  }
   0x1   :  { %s987_s14 = smov 0  }
   0x2 LB: > { %s25_s15 = sadd.s32 1, %s956_s13  ;;  %p743_p0 = scmp.ge.s32.totalorder %s960_s14, 1  ;;  %s960_s14 = sphi %s987_s14, %s13_s14   ;;  %s956_s13 = sphi %s985_s13, %s1142_s13   ;;  %s952_s12 = sphi %s983_s12, %s1141_s12  }
   0x3   : > { %p27_p1 = scmp.ge.s32.totalorder %s25_s15, 2  ;;  %p174_p2 = scmp.lt.s32.totalorder %s960_s14, 3 }
   0x5   : > { %s1144_s15 = smov (%p27_p1, %s25_s15), 0  ;;  %p175_p3 = pnand %p743_p0, %p174_p2 }
   0x6   : > { %p214_p4 = scmp.lt.s32.totalorder (!%p175_p3), %s952_s12, 1 }
   0x7   : > { %178 = sbr.rel (%p175_p3) target bundleno = 219 (0xdb), region = 32 }
   0xc   : > { %s1146_s12 = smov (!%p214_p4, %s952_s12), 1  ;;  %v878_v0 = vld [vmem:[%s1138_s1 + $0x4] sm:$0xf]  ;;  %v750_v1 = vld [vmem:[%s1138_s1 + $0x8] sm:$0xf0]  ;;  %vm470_vm0 = vcmask 130048  }
   0xd   : > { %s909_s16 = smul.u32 216, %s1146_s12  ;;  %v1024_v15 = vor.u32 %v878_v0, %v750_v1  ;;  %v880_v52 = vld [vmem:[%s1138_s1 + $0x14] sm:$0xf]  ;;  %v758_v54 = vld [vmem:[%s1138_s1 + $0x18] sm:$0xf0]  ;;  %v284_v62 = vld [vmem:[%s1139_s2] sm:$0xff] }
   0xe   : > { %v761_v63 = vor.u32 %v880_v52, %v758_v54  ;;  %v962_v1 = vmov 0   ;;  %s910_s21 = smul.u32 48, %s1146_s12  ;;  %vm612_vm1 = vcmask 257024  }
   0xf   : > { %s1007_s19 = scalar_lea.vmem %s1137_s0, %s909_s16  ;;  %936 = vset.pattern.permute.xlu0 %v962_v1  ;;  %937 = vset.pattern.permute.xlu1 %v962_v1 }
  0x10   : > { %v848_v2 = vld [vmem:[%s1007_s19 + $0xa8] sm:$0xf]  ;;  %v904_v3 = vld [vmem:[%s1007_s19 + $0xb0] sm:$0xf0]  ;;  %v860_v4 = vld [vmem:[%s1007_s19 + $0xc0] sm:$0xf]  ;;  %290 = vperm.xlu0 %936, %v284_v62   ;;  %s1114_s24 = scalar_lea.vmem %s1140_s3, %s910_s21 }
  0x11   : > { %v849_v5 = vor.u32 %v904_v3, %v848_v2  ;;  %v907_v6 = vld [vmem:[%s1007_s19 + $0xc8] sm:$0xf0]  ;;  %v850_v8 = vld [vmem:[%s1007_s19 + $0xb4] sm:$0xf0]  ;;  %v906_v11 = vld [vmem:[%s1007_s19 + $0xc4] sm:$0xf] }
  0x12   : > { %v903_v7 = vld [vmem:[%s1007_s19 + $0xac] sm:$0xf]  ;;  %v861_v9 = vor.u32 %v907_v6, %v860_v4  ;;  %v862_v12 = vld [vmem:[%s1007_s19 + $0xcc] sm:$0xf0]  ;;  %v868_v13 = vld [vmem:[%s1007_s19 + $0xc8] sm:$0xf] }
  0x13   : > { %v853_v10 = vor.u32 %v903_v7, %v850_v8  ;;  %477 = vmatpush.bf16.msra.mxu0 %v849_v5  ;;  %v865_v14 = vor.u32 %v906_v11, %v862_v12  ;;  %v908_v16 = vld [vmem:[%s1007_s19 + $0xd0] sm:$0xf0]  ;;  %v836_v17 = vld [vmem:[%s1007_s19 + $0x90] sm:$0xf]  ;;  %v901_v18 = vld [vmem:[%s1007_s19 + $0x98] sm:$0xf0] }
  0x14   : > { %503 = vmatpush.bf16.msra.mxu1 %v861_v9  ;;  %v869_v19 = vor.u32 %v908_v16, %v868_v13  ;;  %v837_v20 = vor.u32 %v901_v18, %v836_v17  ;;  %v900_v21 = vld [vmem:[%s1007_s19 + $0x94] sm:$0xf]  ;;  %v838_v22 = vld [vmem:[%s1007_s19 + $0x9c] sm:$0xf0]  ;;  %v856_v23 = vld [vmem:[%s1007_s19 + $0xb0] sm:$0xf] }
  0x15   : > { %515 = vmatpush.bf16.msra.mxu2 %v853_v10  ;;  %541 = vmatpush.bf16.msra.mxu3 %v865_v14  ;;  %v841_v24 = vor.u32 %v900_v21, %v838_v22  ;;  %v905_v25 = vld [vmem:[%s1007_s19 + $0xb8] sm:$0xf0]  ;;  %v824_v26 = vld [vmem:[%s1007_s19 + $0x78] sm:$0xf]  ;;  %v898_v27 = vld [vmem:[%s1007_s19 + $0x80] sm:$0xf0] }
  0x16   : > { %v857_v28 = vor.u32 %v905_v25, %v856_v23  ;;  %v897_v29 = vld [vmem:[%s1007_s19 + $0x7c] sm:$0xf]  ;;  %v826_v30 = vld [vmem:[%s1007_s19 + $0x84] sm:$0xf0]  ;;  %v844_v31 = vld [vmem:[%s1007_s19 + $0x98] sm:$0xf]  ;;  %v825_v32 = vor.u32 %v898_v27, %v824_v26 }
  0x17   : > { %870 = vmatmul.msk.bf16.vlgmr.msra.gmra.mxu1 %vm470_vm0, %v1024_v15  ;;  %478 = vmatpush.bf16.msra.mxu0 %v837_v20  ;;  %v902_v33 = vld [vmem:[%s1007_s19 + $0xa0] sm:$0xf0]  ;;  %v829_v34 = vor.u32 %v897_v29, %v826_v30  ;;  %v812_v35 = vld [vmem:[%s1007_s19 + $0x60] sm:$0xf]  ;;  %v895_v36 = vld [vmem:[%s1007_s19 + $0x68] sm:$0xf0] }
  0x18   : > { %872 = vmatmul.msk.bf16.vlgmr.msra.gmra.mxu3 %vm470_vm0, %v1024_v15  ;;  %553 = vmatpush.bf16.msrb.mxu1 %v857_v28  ;;  %v845_v37 = vor.u32 %v902_v33, %v844_v31  ;;  %v894_v38 = vld [vmem:[%s1007_s19 + $0x64] sm:$0xf]  ;;  %v814_v39 = vld [vmem:[%s1007_s19 + $0x6c] sm:$0xf0]  ;;  %v832_v40 = vld [vmem:[%s1007_s19 + $0x80] sm:$0xf]  ;;  %v813_v42 = vor.u32 %v895_v36, %v812_v35 }
  0x19   : > { %579 = vmatpush.bf16.msrb.mxu3 %v869_v19  ;;  %516 = vmatpush.bf16.msra.mxu2 %v841_v24  ;;  %v899_v41 = vld [vmem:[%s1007_s19 + $0x88] sm:$0xf0]  ;;  %v817_v43 = vor.u32 %v894_v38, %v814_v39  ;;  %v800_v44 = vld [vmem:[%s1007_s19 + $0x48] sm:$0xf]  ;;  %v892_v45 = vld [vmem:[%s1007_s19 + $0x50] sm:$0xf0] }
  0x1a   : > { %v833_v46 = vor.u32 %v899_v41, %v832_v40  ;;  %v891_v47 = vld [vmem:[%s1007_s19 + $0x4c] sm:$0xf]  ;;  %v802_v48 = vld [vmem:[%s1007_s19 + $0x54] sm:$0xf0]  ;;  %v820_v49 = vld [vmem:[%s1007_s19 + $0x68] sm:$0xf]  ;;  %v801_v51 = vor.u32 %v892_v45, %v800_v44 }
  0x1b   : > { %479 = vmatpush.bf16.msra.mxu0 %v825_v32  ;;  %v896_v50 = vld [vmem:[%s1007_s19 + $0x70] sm:$0xf0]  ;;  %v805_v53 = vor.u32 %v891_v47, %v802_v48  ;;  %v788_v55 = vld [vmem:[%s1007_s19 + $0x30] sm:$0xf]  ;;  %v889_v56 = vld [vmem:[%s1007_s19 + $0x38] sm:$0xf0] }
  0x1c   : > { %554 = vmatpush.bf16.msrb.mxu1 %v845_v37  ;;  %v821_v57 = vor.u32 %v896_v50, %v820_v49  ;;  %v888_v58 = vld [vmem:[%s1007_s19 + $0x34] sm:$0xf]  ;;  %v790_v59 = vld [vmem:[%s1007_s19 + $0x3c] sm:$0xf0]  ;;  %v808_v60 = vld [vmem:[%s1007_s19 + $0x50] sm:$0xf]  ;;  %v789_v0 = vor.u32 %v889_v56, %v788_v55 }
  0x1d   : > { %517 = vmatpush.bf16.msra.mxu2 %v829_v34  ;;  %v893_v61 = vld [vmem:[%s1007_s19 + $0x58] sm:$0xf0]  ;;  %v793_v2 = vor.u32 %v888_v58, %v790_v59  ;;  %v776_v3 = vld [vmem:[%s1007_s19 + $0x18] sm:$0xf]  ;;  %v886_v4 = vld [vmem:[%s1007_s19 + $0x20] sm:$0xf0] }
  0x1e   : > { %v809_v5 = vor.u32 %v893_v61, %v808_v60  ;;  %v885_v6 = vld [vmem:[%s1007_s19 + $0x1c] sm:$0xf]  ;;  %v778_v7 = vld [vmem:[%s1007_s19 + $0x24] sm:$0xf0]  ;;  %v796_v8 = vld [vmem:[%s1007_s19 + $0x38] sm:$0xf]  ;;  %v777_v10 = vor.u32 %v886_v4, %v776_v3 }
  0x1f   : > { %480 = vmatpush.bf16.msra.mxu0 %v813_v42  ;;  %v890_v9 = vld [vmem:[%s1007_s19 + $0x40] sm:$0xf0]  ;;  %v781_v11 = vor.u32 %v885_v6, %v778_v7  ;;  %v764_v12 = vld [vmem:[%s1007_s19] sm:$0xf]  ;;  %v883_v13 = vld [vmem:[%s1007_s19 + $0x8] sm:$0xf0] }
  0x20   : > { %555 = vmatpush.bf16.msrb.mxu1 %v833_v46  ;;  %v286_v14 = vld [vmem:[%s1139_s2 + $0x10] sm:$0xff]  ;;  %v797_v16 = vor.u32 %v890_v9, %v796_v8  ;;  %v882_v17 = vld [vmem:[%s1007_s19 + $0x4] sm:$0xf]  ;;  %v285_v19 = vld [vmem:[%s1139_s2 + $0x8] sm:$0xff]  ;;  %v765_v22 = vor.u32 %v883_v13, %v764_v12 }
  0x21   : > { %518 = vmatpush.bf16.msra.mxu2 %v817_v43  ;;  %v766_v18 = vld [vmem:[%s1007_s19 + $0xc] sm:$0xf0]  ;;  %300 = vperm.xlu1 %937, %v286_v14   ;;  %v784_v20 = vld [vmem:[%s1007_s19 + $0x20] sm:$0xf]  ;;  %v887_v21 = vld [vmem:[%s1007_s19 + $0x28] sm:$0xf0] }
  0x22   : > { %v748_v23 = vld [vmem:[%s1138_s1] sm:$0xf]  ;;  %v879_v24 = vld [vmem:[%s1138_s1 + $0x4] sm:$0xf0]  ;;  %v769_v25 = vor.u32 %v882_v17, %v766_v18  ;;  %295 = vperm.xlu0 %936, %v285_v19   ;;  %v785_v26 = vor.u32 %v887_v21, %v784_v20  ;;  %v884_v29 = vld [vmem:[%s1007_s19 + $0x10] sm:$0xf0] }
  0x23   : > { %481 = vmatpush.bf16.msra.mxu0 %v801_v51  ;;  %v749_v27 = vor.u32 %v879_v24, %v748_v23  ;;  %v772_v28 = vld [vmem:[%s1007_s19 + $0x8] sm:$0xf]  ;;  %v287_v30 = vld [vmem:[%s1139_s2 + $0x18] sm:$0xff]  ;;  %v756_v32 = vld [vmem:[%s1138_s1 + $0x10] sm:$0xf] }
  0x24   : > { %556 = vmatpush.bf16.msrb.mxu1 %v821_v57  ;;  %v773_v31 = vor.u32 %v884_v29, %v772_v28  ;;  %v881_v33 = vld [vmem:[%s1138_s1 + $0x14] sm:$0xf0] }
  0x25   : > { %519 = vmatpush.bf16.msra.mxu2 %v805_v53  ;;  %v757_v34 = vor.u32 %v881_v33, %v756_v32 }
  0x27   : > { %871 = vmatmul.msk.bf16.gmra.mxu1 %vm470_vm0, %v761_v63  ;;  %482 = vmatpush.bf16.msra.mxu0 %v789_v0 }
  0x28   : > { %873 = vmatmul.msk.bf16.gmra.mxu3 %vm470_vm0, %v761_v63  ;;  %557 = vmatpush.bf16.msrb.mxu1 %v809_v5 }
  0x29   : > { %520 = vmatpush.bf16.msra.mxu2 %v793_v2  ;;  %305 = vperm.xlu1 %937, %v287_v30  }
  0x2b   : > { %483 = vmatpush.bf16.msra.mxu0 %v777_v10 }
  0x2c   : > { %558 = vmatpush.bf16.msrb.mxu1 %v797_v16 }
  0x2d   : > { %521 = vmatpush.bf16.msra.mxu2 %v781_v11 }
  0x2f   : > { %484 = vmatpush.bf16.msra.mxu0 %v765_v22 }
  0x30   : > { %559 = vmatpush.bf16.msrb.mxu1 %v785_v26 }
  0x31   : > { %522 = vmatpush.bf16.msra.mxu2 %v769_v25 }
  0x32   : > { %485 = vmatmul.bf16.vlgmr.msra.gmra.mxu0 %v749_v27 }
  0x34   : > { %523 = vmatmul.bf16.vlgmr.msra.gmra.mxu2 %v749_v27  ;;  %560 = vmatpush.bf16.msrb.mxu1 %v773_v31 }
  0x37   : > { %561 = vmatmul.bf16.vlgmr.msrb.gmra.mxu1 %v749_v27 }
  0x38   : > { %874 = vmatmul.msk.bf16.vlgmr.msrb.gmra.mxu3 %vm470_vm0, %v1024_v15 }
  0x42   : > { %490 = vmatmul.bf16.gmra.mxu0 %v757_v34 }
  0x44   : > { %528 = vmatmul.bf16.gmra.mxu2 %v757_v34 }
  0x47   : > { %566 = vmatmul.bf16.gmra.mxu1 %v757_v34 }
  0x48   : > { %875 = vmatmul.msk.bf16.gmra.mxu3 %vm470_vm0, %v761_v63 }
  0x82   : > { %v291_v41 = vpop.permute.xlu0 %290 }
  0x93   : > { %v301_v62 = vpop.permute.xlu1 %300 }
  0x94   : > { %v505_v35 = vpop.f32.mrf.mxu1  ;;  %v296_v51 = vpop.permute.xlu0 %295 }
  0x9b   : > { %v543_v36 = vpop.f32.mrf.mxu3  ;;  %v306_v19 = vpop.permute.xlu1 %305 }
  0x9c   : > { %v507_v37 = vpop.f32.mrf.mxu1 }
  0xa3   : > { %v545_v38 = vpop.f32.mrf.mxu3 }
  0xa4   : > { %v510_v15 = vpop.f32.mrf.mxu1 }
  0xab   : > { %v548_v39 = vpop.f32.mrf.mxu3 }
  0xac   : > { %v512_v40 = vpop.f32.mrf.mxu1 }
  0xaf   : > { %v486_v42 = vpop.f32.mrf.mxu0 }
  0xb0   : > { %v487_v43 = vadd.f32 %v486_v42, %v291_v41 }
  0xb2   : > { %v506_v47 = vadd.f32 %v505_v35, %v487_v43 }
  0xb3   : > { %v550_v44 = vpop.f32.mrf.mxu3 }
  0xb4   : > { %v562_v45 = vpop.f32.mrf.mxu1  ;;  %v591_v53 = vmax.f32 %v506_v47, 0.0 }
  0xb5   : > { %v563_v50 = vadd.f32 %v562_v45, %v291_v41 }
  0xb7   : > { %v524_v46 = vpop.f32.mrf.mxu2  ;;  %v488_v49 = vpop.f32.mrf.mxu0 }
  0xb8   : > { %v525_v48 = vadd.f32 %v524_v46, %v291_v41  ;;  %v489_v55 = vadd.f32 %v488_v49, %v296_v51 }
  0xba   : > { %v544_v52 = vadd.f32 %v543_v36, %v525_v48  ;;  %v508_v63 = vadd.f32 %v507_v37, %v489_v55 }
  0xbb   : > { %v581_v56 = vpop.f32.mrf.mxu3 }
  0xbc   : > { %v592_v54 = vmax.f32 %v544_v52, 0.0  ;;  %v582_v57 = vadd.f32 %v581_v56, %v563_v50  ;;  %v564_v59 = vpop.f32.mrf.mxu1  ;;  %v594_v5 = vmax.f32 %v508_v63, 0.0 }
  0xbd   : > { %v565_v4 = vadd.f32 %v564_v59, %v296_v51 }
  0xbe   : > { %v603_v58 = vpack.c.bf16 %v592_v54, %v591_v53  ;;  %v593_v60 = vmax.f32 %v582_v57, 0.0 }
  0xbf   : > { %v526_v61 = vpop.f32.mrf.mxu2  ;;  %v491_v1 = vpop.f32.mrf.mxu0 }
  0xc0   : > { %611 = vst [vmem:[%s1114_s24] sm:$0xff] %v603_v58  ;;  %v527_v0 = vadd.f32 %v526_v61, %v296_v51  ;;  %v604_v2 = vpack.c.bf16 %v593_v60, %v593_v60  ;;  %v492_v7 = vadd.f32 %v491_v1, %v301_v62 }
  0xc2   : > { %v546_v3 = vadd.f32 %v545_v38, %v527_v0  ;;  %613 = vst.msk [vmem:[%s1114_s24 + $0x8] sm:$0xf] %vm612_vm1, %v604_v2  ;;  %v511_v14 = vadd.f32 %v510_v15, %v492_v7 }
  0xc3   : > { %v583_v8 = vpop.f32.mrf.mxu3 }
  0xc4   : > { %v595_v6 = vmax.f32 %v546_v3, 0.0  ;;  %v584_v9 = vadd.f32 %v583_v8, %v565_v4  ;;  %v567_v11 = vpop.f32.mrf.mxu1  ;;  %v597_v22 = vmax.f32 %v511_v14, 0.0 }
  0xc5   : > { %v568_v18 = vadd.f32 %v567_v11, %v301_v62 }
  0xc6   : > { %v605_v10 = vpack.c.bf16 %v595_v6, %v594_v5  ;;  %v596_v12 = vmax.f32 %v584_v9, 0.0 }
  0xc7   : > { %v529_v13 = vpop.f32.mrf.mxu2  ;;  %v493_v20 = vpop.f32.mrf.mxu0 }
  0xc8   : > { %614 = vst [vmem:[%s1114_s24 + $0xc] sm:$0xff] %v605_v10  ;;  %v530_v16 = vadd.f32 %v529_v13, %v301_v62  ;;  %v606_v17 = vpack.c.bf16 %v596_v12, %v596_v12  ;;  %v494_v24 = vadd.f32 %v493_v20, %v306_v19 }
  0xca   : > { %v549_v21 = vadd.f32 %v548_v39, %v530_v16  ;;  %615 = vst.msk [vmem:[%s1114_s24 + $0x14] sm:$0xf] %vm612_vm1, %v606_v17  ;;  %v513_v30 = vadd.f32 %v512_v40, %v494_v24 }
  0xcb   : > { %v586_v25 = vpop.f32.mrf.mxu3 }
  0xcc   : > { %v598_v23 = vmax.f32 %v549_v21, 0.0  ;;  %v587_v26 = vadd.f32 %v586_v25, %v568_v18  ;;  %v569_v31 = vpop.f32.mrf.mxu1  ;;  %v600_v36 = vmax.f32 %v513_v30, 0.0 }
  0xcd   : > { %v570_v35 = vadd.f32 %v569_v31, %v306_v19 }
  0xce   : > { %v607_v27 = vpack.c.bf16 %v598_v23, %v597_v22  ;;  %v599_v28 = vmax.f32 %v587_v26, 0.0 }
  0xcf   : > { %v531_v29 = vpop.f32.mrf.mxu2 }
  0xd0   : > { %616 = vst [vmem:[%s1114_s24 + $0x18] sm:$0xff] %v607_v27  ;;  %v532_v32 = vadd.f32 %v531_v29, %v306_v19  ;;  %v608_v33 = vpack.c.bf16 %v599_v28, %v599_v28 }
  0xd2   : > { %v551_v34 = vadd.f32 %v550_v44, %v532_v32  ;;  %617 = vst.msk [vmem:[%s1114_s24 + $0x20] sm:$0xf] %vm612_vm1, %v608_v33 }
  0xd3   : > { %v588_v38 = vpop.f32.mrf.mxu3 }
  0xd4   : > { %v601_v37 = vmax.f32 %v551_v34, 0.0  ;;  %v589_v15 = vadd.f32 %v588_v38, %v570_v35 }
  0xd6   : > { %v609_v39 = vpack.c.bf16 %v601_v37, %v600_v36  ;;  %v602_v41 = vmax.f32 %v589_v15, 0.0 }
  0xd8   : > { %618 = vst [vmem:[%s1114_s24 + $0x24] sm:$0xff] %v609_v39  ;;  %v610_v42 = vpack.c.bf16 %v602_v41, %v602_v41 }
  0xda   : > { %619 = vst.msk [vmem:[%s1114_s24 + $0x2c] sm:$0xf] %vm612_vm1, %v610_v42 }
  0xdb PF: > { %s13_s14 = sadd.s32 1, %s960_s14   ;;  %s1141_s12 = smov %s956_s13 }
  0xdc   : > { %p10_p5 = scmp.ge.s32.totalorder %s13_s14, 4   ;;  %s1142_s13 = smov %s1144_s15 }
  0xde   :  { %12 = sbr.rel (!%p10_p5) target bundleno = 2 (0x2), region = 68 }

// kernel: _decoder_forward.6
= control target key start
LH: loop header
LB: loop body
LE: loop exit
PB: predicated region body
PF: predicated region fallthrough
CT: control target
= control target key end

     0   :  { %s1104_s12 = smov 0   ;;  %s1106_s13 = smov 0   ;;  %s1292_s0 = inlined_call_operand.vmem [shape: bf16[2,72,1088], index: 0, kind: input, shape index: {}]   ;;  %s1293_s1 = inlined_call_operand.vmem [shape: bf16[16,72], index: 1, kind: input, shape index: {}]   ;;  %s1294_s2 = inlined_call_operand.vmem [shape: f32[16,1], index: 2, kind: input, shape index: {}]   ;;  %s1295_s3 = inlined_call_operand.vmem [shape: bf16[2,16,1088], index: 3, kind: output, shape index: {}]  }
   0x1   :  { %s1108_s14 = smov 0  }
   0x2 LB: > { %s25_s15 = sadd.s32 1, %s1077_s13  ;;  %p832_p0 = scmp.ge.s32.totalorder %s1081_s14, 1  ;;  %s1081_s14 = sphi %s1108_s14, %s13_s14   ;;  %s1077_s13 = sphi %s1106_s13, %s1297_s13   ;;  %s1073_s12 = sphi %s1104_s12, %s1296_s12  }
   0x3   : > { %p27_p1 = scmp.ge.s32.totalorder %s25_s15, 2  ;;  %p173_p2 = scmp.lt.s32.totalorder %s1081_s14, 3 }
   0x5   : > { %s1299_s15 = smov (%p27_p1, %s25_s15), 0  ;;  %p174_p3 = pnand %p832_p0, %p173_p2 }
   0x6   : > { %p212_p4 = scmp.lt.s32.totalorder (!%p174_p3), %s1073_s12, 1 }
   0x7   : > { %177 = sbr.rel (%p174_p3) target bundleno = 222 (0xde), region = 32 }
   0xc   : > { %s1301_s12 = smov (!%p212_p4, %s1073_s12), 1  ;;  %vm516_vm0 = vcmask 1043456   ;;  %v1083_v50 = vmov 0   ;;  %vm512_vm1 = vcmask 588800   ;;  %vm702_vm2 = vcmask 519168  }
   0xd   : > { %s1031_s16 = smul.u32 324, %s1301_s12  ;;  %1058 = vset.pattern.permute.xlu0 %v1083_v50 }
   0xe   : > { %s1032_s26 = smul.u32 72, %s1301_s12 }
   0xf   : > { %s1128_s19 = scalar_lea.vmem %s1292_s0, %s1031_s16 }
  0x10   : > { %v283_v0 = vld [vmem:[%s1128_s19 + $0x120] sm:$0xff]  ;;  %v284_v1 = vld [vmem:[%s1128_s19 + $0x128] sm:$0xff]  ;;  %v949_v6 = vld [vmem:[%s1128_s19 + $0xd8] sm:$0xf]  ;;  %s1253_s29 = scalar_lea.vmem %s1295_s3, %s1032_s26 }
  0x11   : > { %v422_v2 = vunpack.c.l.b16 %v283_v0  ;;  %v423_v3 = vunpack.c.h.b16 %v283_v0  ;;  %v424_v4 = vunpack.c.l.b16 %v284_v1  ;;  %v425_v5 = vunpack.c.h.b16 %v284_v1  ;;  %v1026_v7 = vld [vmem:[%s1128_s19 + $0xf8] sm:$0xf0]  ;;  %v951_v13 = vld [vmem:[%s1128_s19 + $0xfc] sm:$0xf0]  ;;  %v1027_v15 = vld [vmem:[%s1128_s19 + $0x100] sm:$0xf0] }
  0x12   : > { %v1022_v12 = vld [vmem:[%s1128_s19 + $0xdc] sm:$0xf]  ;;  %v957_v14 = vld [vmem:[%s1128_s19 + $0xe0] sm:$0xf]  ;;  %v1023_v16 = vld [vmem:[%s1128_s19 + $0xe4] sm:$0xf]  ;;  %v950_v22 = vor.u32 %v1026_v7, %v949_v6 }
  0x13   : > { %v467_v8 = vpack.c.b16 %v422_v2, %v422_v2  ;;  %v468_v9 = vpack.c.b16 %v423_v3, %v423_v3  ;;  %v469_v10 = vpack.c.b16 %v424_v4, %v424_v4  ;;  %v470_v11 = vpack.c.b16 %v425_v5, %v425_v5  ;;  %v959_v17 = vld [vmem:[%s1128_s19 + $0x104] sm:$0xf0]  ;;  %v913_v24 = vld [vmem:[%s1128_s19 + $0x90] sm:$0xf]  ;;  %v1017_v25 = vld [vmem:[%s1128_s19 + $0xb0] sm:$0xf0] }
  0x14   : > { %v954_v23 = vor.u32 %v1022_v12, %v951_v13  ;;  %v958_v26 = vor.u32 %v1027_v15, %v957_v14  ;;  %v962_v27 = vor.u32 %v1023_v16, %v959_v17  ;;  %v1013_v28 = vld [vmem:[%s1128_s19 + $0x94] sm:$0xf]  ;;  %v915_v29 = vld [vmem:[%s1128_s19 + $0xb4] sm:$0xf0]  ;;  %v1018_v31 = vld [vmem:[%s1128_s19 + $0xb8] sm:$0xf0]  ;;  %v914_v35 = vor.u32 %v1017_v25, %v913_v24 }
  0x15   : > { %v518_v18 = vsel %vm516_vm0, %v467_v8, 0  ;;  %v521_v19 = vsel %vm516_vm0, %v468_v9, 0  ;;  %v524_v20 = vsel %vm516_vm0, %v469_v10, 0  ;;  %v527_v21 = vsel %vm516_vm0, %v470_v11, 0  ;;  %v921_v30 = vld [vmem:[%s1128_s19 + $0x98] sm:$0xf] }
  0x16   : > { %547 = vmatpush.bf16.msra.mxu0 %v518_v18  ;;  %561 = vmatpush.bf16.msra.mxu1 %v521_v19  ;;  %v1014_v32 = vld [vmem:[%s1128_s19 + $0x9c] sm:$0xf]  ;;  %v923_v33 = vld [vmem:[%s1128_s19 + $0xbc] sm:$0xf0]  ;;  %v877_v34 = vld [vmem:[%s1128_s19 + $0x48] sm:$0xf]  ;;  %v918_v36 = vor.u32 %v1013_v28, %v915_v29  ;;  %v922_v40 = vor.u32 %v1018_v31, %v921_v30 }
  0x17   : > { %575 = vmatpush.bf16.msra.mxu2 %v524_v20  ;;  %589 = vmatpush.bf16.msra.mxu3 %v527_v21  ;;  %v1008_v37 = vld [vmem:[%s1128_s19 + $0x68] sm:$0xf0]  ;;  %v285_v39 = vld [vmem:[%s1128_s19 + $0x130] sm:$0xff]  ;;  %v926_v41 = vor.u32 %v1014_v32, %v923_v33  ;;  %v887_v46 = vld [vmem:[%s1128_s19 + $0x74] sm:$0xf0] }
  0x18   : > { %v1004_v38 = vld [vmem:[%s1128_s19 + $0x4c] sm:$0xf]  ;;  %v879_v42 = vld [vmem:[%s1128_s19 + $0x6c] sm:$0xf0]  ;;  %v1009_v44 = vld [vmem:[%s1128_s19 + $0x70] sm:$0xf0]  ;;  %v426_v47 = vunpack.c.l.b16 %v285_v39  ;;  %v427_v48 = vunpack.c.h.b16 %v285_v39  ;;  %v878_v51 = vor.u32 %v1008_v37, %v877_v34 }
  0x19   : > { %v885_v43 = vld [vmem:[%s1128_s19 + $0x50] sm:$0xf]  ;;  %v1005_v45 = vld [vmem:[%s1128_s19 + $0x54] sm:$0xf]  ;;  %v286_v49 = vld [vmem:[%s1128_s19 + $0x138] sm:$0xff]  ;;  %v882_v52 = vor.u32 %v1004_v38, %v879_v42 }
  0x1a   : > { %548 = vmatpush.bf16.msra.mxu0 %v950_v22  ;;  %562 = vmatpush.bf16.msra.mxu1 %v954_v23  ;;  %v841_v53 = vld [vmem:[%s1128_s19] sm:$0xf]  ;;  %v886_v54 = vor.u32 %v1009_v44, %v885_v43  ;;  %v890_v55 = vor.u32 %v1005_v45, %v887_v46  ;;  %v999_v56 = vld [vmem:[%s1128_s19 + $0x20] sm:$0xf0]  ;;  %v843_v58 = vld [vmem:[%s1128_s19 + $0x24] sm:$0xf0]  ;;  %v428_v59 = vunpack.c.l.b16 %v286_v49  ;;  %v429_v60 = vunpack.c.h.b16 %v286_v49 }
  0x1b   : > { %576 = vmatpush.bf16.msra.mxu2 %v958_v26  ;;  %590 = vmatpush.bf16.msra.mxu3 %v962_v27  ;;  %v995_v57 = vld [vmem:[%s1128_s19 + $0x4] sm:$0xf]  ;;  %v471_v61 = vpack.c.b16 %v426_v47, %v426_v47  ;;  %v472_v62 = vpack.c.b16 %v427_v48, %v427_v48  ;;  %v849_v63 = vld [vmem:[%s1128_s19 + $0x8] sm:$0xf]  ;;  %v1000_v0 = vld [vmem:[%s1128_s19 + $0x28] sm:$0xf0]  ;;  %v842_v4 = vor.u32 %v999_v56, %v841_v53 }
  0x1c   : > { %v996_v1 = vld [vmem:[%s1128_s19 + $0xc] sm:$0xf]  ;;  %v851_v2 = vld [vmem:[%s1128_s19 + $0x2c] sm:$0xf0]  ;;  %v288_v3 = vld [vmem:[%s1294_s2] sm:$0xff]  ;;  %v846_v5 = vor.u32 %v995_v57, %v843_v58  ;;  %v473_v6 = vpack.c.b16 %v428_v59, %v428_v59  ;;  %v474_v7 = vpack.c.b16 %v429_v60, %v429_v60  ;;  %v850_v12 = vor.u32 %v1000_v0, %v849_v63 }
  0x1d   : > { %v965_v8 = vld [vmem:[%s1128_s19 + $0xe8] sm:$0xf]  ;;  %v1028_v9 = vld [vmem:[%s1128_s19 + $0x108] sm:$0xf0]  ;;  %v530_v10 = vsel %vm516_vm0, %v471_v61, 0  ;;  %v533_v11 = vsel %vm516_vm0, %v472_v62, 0  ;;  %v854_v13 = vor.u32 %v996_v1, %v851_v2  ;;  %292 = vperm.xlu0 %1058, %v288_v3  }
  0x1e   : > { %549 = vmatpush.bf16.msra.mxu0 %v914_v35  ;;  %563 = vmatpush.bf16.msra.mxu1 %v918_v36  ;;  %v1024_v14 = vld [vmem:[%s1128_s19 + $0xec] sm:$0xf]  ;;  %v967_v15 = vld [vmem:[%s1128_s19 + $0x10c] sm:$0xf0]  ;;  %v1182_v16 = vld [vmem:[%s1293_s1] sm:$0xff]  ;;  %v536_v20 = vsel %vm516_vm0, %v473_v6, 0  ;;  %v966_v22 = vor.u32 %v1028_v9, %v965_v8 }
  0x1f   : > { %577 = vmatpush.bf16.msra.mxu2 %v922_v40  ;;  %591 = vmatpush.bf16.msra.mxu3 %v926_v41  ;;  %v973_v17 = vld [vmem:[%s1128_s19 + $0xf0] sm:$0xf]  ;;  %v1029_v18 = vld [vmem:[%s1128_s19 + $0x110] sm:$0xf0]  ;;  %v539_v21 = vsel %vm516_vm0, %v474_v7, 0  ;;  %v970_v23 = vor.u32 %v1024_v14, %v967_v15  ;;  %v289_v34 = vld [vmem:[%s1294_s2 + $0x8] sm:$0xff] }
  0x20   : > { %v1025_v19 = vld [vmem:[%s1128_s19 + $0xf4] sm:$0xf]  ;;  %v975_v24 = vld [vmem:[%s1128_s19 + $0x114] sm:$0xf0]  ;;  %v929_v25 = vld [vmem:[%s1128_s19 + $0xa0] sm:$0xf]  ;;  %v974_v30 = vor.u32 %v1029_v18, %v973_v17 }
  0x21   : > { %v1019_v26 = vld [vmem:[%s1128_s19 + $0xc0] sm:$0xf0]  ;;  %v931_v28 = vld [vmem:[%s1128_s19 + $0xc4] sm:$0xf0]  ;;  %v978_v31 = vor.u32 %v1025_v19, %v975_v24  ;;  %v1020_v32 = vld [vmem:[%s1128_s19 + $0xc8] sm:$0xf0] }
  0x22   : > { %550 = vmatpush.bf16.msra.mxu0 %v878_v51  ;;  %564 = vmatpush.bf16.msra.mxu1 %v882_v52  ;;  %v1015_v27 = vld [vmem:[%s1128_s19 + $0xa4] sm:$0xf]  ;;  %v937_v29 = vld [vmem:[%s1128_s19 + $0xa8] sm:$0xf]  ;;  %v287_v33 = vld [vmem:[%s1128_s19 + $0x140] sm:$0xf]  ;;  %v930_v35 = vor.u32 %v1019_v26, %v929_v25 }
  0x23   : > { %578 = vmatpush.bf16.msra.mxu2 %v886_v54  ;;  %592 = vmatpush.bf16.msra.mxu3 %v890_v55  ;;  %v934_v36 = vor.u32 %v1015_v27, %v931_v28  ;;  %v1016_v37 = vld [vmem:[%s1128_s19 + $0xac] sm:$0xf]  ;;  %v939_v38 = vld [vmem:[%s1128_s19 + $0xcc] sm:$0xf0]  ;;  %v893_v39 = vld [vmem:[%s1128_s19 + $0x58] sm:$0xf]  ;;  %v430_v43 = vunpack.c.l.b16 %v287_v33  ;;  %v938_v44 = vor.u32 %v1020_v32, %v937_v29 }
  0x24   : > { %v1010_v40 = vld [vmem:[%s1128_s19 + $0x78] sm:$0xf0]  ;;  %v895_v42 = vld [vmem:[%s1128_s19 + $0x7c] sm:$0xf0]  ;;  %v942_v45 = vor.u32 %v1016_v37, %v939_v38  ;;  %v1011_v47 = vld [vmem:[%s1128_s19 + $0x80] sm:$0xf0] }
  0x25   : > { %v1006_v41 = vld [vmem:[%s1128_s19 + $0x5c] sm:$0xf]  ;;  %297 = vperm.xlu0 %1058, %v289_v34   ;;  %v901_v46 = vld [vmem:[%s1128_s19 + $0x60] sm:$0xf]  ;;  %v894_v48 = vor.u32 %v1010_v40, %v893_v39  ;;  %v1007_v50 = vld [vmem:[%s1128_s19 + $0x64] sm:$0xf]  ;;  %v475_v56 = vpack.c.b16 %v430_v43, %v430_v43 }
  0x26   : > { %551 = vmatpush.bf16.msra.mxu0 %v842_v4  ;;  %565 = vmatpush.bf16.msra.mxu1 %v846_v5  ;;  %v898_v49 = vor.u32 %v1006_v41, %v895_v42  ;;  %v903_v51 = vld [vmem:[%s1128_s19 + $0x84] sm:$0xf0]  ;;  %v857_v52 = vld [vmem:[%s1128_s19 + $0x10] sm:$0xf]  ;;  %v1001_v53 = vld [vmem:[%s1128_s19 + $0x30] sm:$0xf0]  ;;  %v902_v57 = vor.u32 %v1011_v47, %v901_v46 }
  0x27   : > { %579 = vmatpush.bf16.msra.mxu2 %v850_v12  ;;  %593 = vmatpush.bf16.msra.mxu3 %v854_v13  ;;  %v997_v54 = vld [vmem:[%s1128_s19 + $0x14] sm:$0xf]  ;;  %v859_v55 = vld [vmem:[%s1128_s19 + $0x34] sm:$0xf0]  ;;  %v906_v58 = vor.u32 %v1007_v50, %v903_v51  ;;  %v858_v59 = vor.u32 %v1001_v53, %v857_v52  ;;  %v1002_v62 = vld [vmem:[%s1128_s19 + $0x38] sm:$0xf0] }
  0x28   : > { %v862_v60 = vor.u32 %v997_v54, %v859_v55  ;;  %v865_v61 = vld [vmem:[%s1128_s19 + $0x18] sm:$0xf]  ;;  %v998_v63 = vld [vmem:[%s1128_s19 + $0x1c] sm:$0xf]  ;;  %v867_v0 = vld [vmem:[%s1128_s19 + $0x3c] sm:$0xf0] }
  0x29   : > { %983 = vmatmul.msk.bf16.vlgmr.msra.gmra.mxu0 %vm512_vm1, %v1182_v16  ;;  %984 = vmatmul.msk.bf16.vlgmr.msra.gmra.mxu1 %vm512_vm1, %v1182_v16  ;;  %v542_v1 = vsel %vm516_vm0, %v475_v56, 0  ;;  %v981_v2 = vld [vmem:[%s1128_s19 + $0xf8] sm:$0xf]  ;;  %v1030_v3 = vld [vmem:[%s1128_s19 + $0x118] sm:$0xf0]  ;;  %v866_v4 = vor.u32 %v1002_v62, %v865_v61  ;;  %v870_v5 = vor.u32 %v998_v63, %v867_v0 }
  0x2a   : > { %603 = vmatpush.bf16.msrb.mxu0 %v530_v10  ;;  %617 = vmatpush.bf16.msrb.mxu1 %v533_v11  ;;  %v982_v6 = vor.u32 %v1030_v3, %v981_v2  ;;  %v945_v7 = vld [vmem:[%s1128_s19 + $0xb0] sm:$0xf]  ;;  %v1021_v8 = vld [vmem:[%s1128_s19 + $0xd0] sm:$0xf0]  ;;  %v909_v10 = vld [vmem:[%s1128_s19 + $0x68] sm:$0xf] }
  0x2b   : > { %631 = vmatpush.bf16.msrb.mxu2 %v536_v20  ;;  %645 = vmatpush.bf16.msrb.mxu3 %v539_v21  ;;  %v946_v9 = vor.u32 %v1021_v8, %v945_v7  ;;  %v1012_v11 = vld [vmem:[%s1128_s19 + $0x88] sm:$0xf0]  ;;  %v873_v13 = vld [vmem:[%s1128_s19 + $0x20] sm:$0xf]  ;;  %v1003_v14 = vld [vmem:[%s1128_s19 + $0x40] sm:$0xf0] }
  0x2c   : > { %985 = vmatmul.msk.bf16.vlgmr.msra.gmra.mxu2 %vm512_vm1, %v1182_v16  ;;  %986 = vmatmul.msk.bf16.vlgmr.msra.gmra.mxu3 %vm512_vm1, %v1182_v16  ;;  %v910_v12 = vor.u32 %v1012_v11, %v909_v10  ;;  %v874_v15 = vor.u32 %v1003_v14, %v873_v13 }
  0x2e   : > { %604 = vmatpush.bf16.msrb.mxu0 %v966_v22  ;;  %618 = vmatpush.bf16.msrb.mxu1 %v970_v23 }
  0x2f   : > { %632 = vmatpush.bf16.msrb.mxu2 %v974_v30  ;;  %646 = vmatpush.bf16.msrb.mxu3 %v978_v31 }
  0x32   : > { %605 = vmatpush.bf16.msrb.mxu0 %v930_v35  ;;  %619 = vmatpush.bf16.msrb.mxu1 %v934_v36 }
  0x33   : > { %633 = vmatpush.bf16.msrb.mxu2 %v938_v44  ;;  %647 = vmatpush.bf16.msrb.mxu3 %v942_v45 }
  0x36   : > { %606 = vmatpush.bf16.msrb.mxu0 %v894_v48  ;;  %620 = vmatpush.bf16.msrb.mxu1 %v898_v49 }
  0x37   : > { %634 = vmatpush.bf16.msrb.mxu2 %v902_v57  ;;  %648 = vmatpush.bf16.msrb.mxu3 %v906_v58 }
  0x3a   : > { %607 = vmatpush.bf16.msrb.mxu0 %v858_v59  ;;  %621 = vmatpush.bf16.msrb.mxu1 %v862_v60 }
  0x3b   : > { %635 = vmatpush.bf16.msrb.mxu2 %v866_v4  ;;  %649 = vmatpush.bf16.msrb.mxu3 %v870_v5 }
  0x3d   : > { %987 = vmatmul.msk.bf16.vlgmr.msrb.gmra.mxu0 %vm512_vm1, %v1182_v16  ;;  %988 = vmatmul.msk.bf16.vlgmr.msrb.gmra.mxu1 %vm512_vm1, %v1182_v16 }
  0x3e   : > { %659 = vmatpush.bf16.msra.mxu0 %v542_v1  ;;  %989 = vmatmul.msk.bf16.vlgmr.msrb.gmra.mxu2 %vm512_vm1, %v1182_v16 }
  0x3f   : > { %990 = vmatmul.msk.bf16.vlgmr.msrb.gmra.mxu3 %vm512_vm1, %v1182_v16 }
  0x42   : > { %660 = vmatpush.bf16.msra.mxu0 %v982_v6 }
  0x46   : > { %661 = vmatpush.bf16.msra.mxu0 %v946_v9 }
  0x4a   : > { %662 = vmatpush.bf16.msra.mxu0 %v910_v12 }
  0x4e   : > { %663 = vmatpush.bf16.msra.mxu0 %v874_v15 }
  0x51   : > { %991 = vmatmul.msk.bf16.vlgmr.msra.gmra.mxu0 %vm512_vm1, %v1182_v16 }
  0x8f   : > { %v1245_v17 = vpop.permute.xlu0 %292 }
  0x97   : > { %v1255_v25 = vpop.permute.xlu0 %297 }
  0xa6   : > { %v553_v18 = vpop.f32.mrf.mxu0  ;;  %v567_v19 = vpop.f32.mrf.mxu1 }
  0xa7   : > { %v554_v20 = vadd.f32 %v553_v18, %v1245_v17  ;;  %v568_v21 = vadd.f32 %v567_v19, %v1245_v17 }
  0xa9   : > { %v670_v22 = vmax.f32 %v554_v20, 0.0  ;;  %v671_v23 = vmax.f32 %v568_v21, 0.0 }
  0xab   : > { %v688_v24 = vpack.c.bf16 %v671_v23, %v670_v22 }
  0xad   : > { %698 = vst [vmem:[%s1253_s29] sm:$0xff] %v688_v24 }
  0xae   : > { %v555_v16 = vpop.f32.mrf.mxu0  ;;  %v569_v26 = vpop.f32.mrf.mxu1 }
  0xaf   : > { %v556_v27 = vadd.f32 %v555_v16, %v1255_v25  ;;  %v570_v28 = vadd.f32 %v569_v26, %v1255_v25  ;;  %v581_v29 = vpop.f32.mrf.mxu2  ;;  %v595_v30 = vpop.f32.mrf.mxu3 }
  0xb0   : > { %v582_v31 = vadd.f32 %v581_v29, %v1245_v17  ;;  %v596_v32 = vadd.f32 %v595_v30, %v1245_v17 }
  0xb1   : > { %v679_v33 = vmax.f32 %v556_v27, 0.0  ;;  %v680_v34 = vmax.f32 %v570_v28, 0.0 }
  0xb2   : > { %v672_v35 = vmax.f32 %v582_v31, 0.0  ;;  %v673_v36 = vmax.f32 %v596_v32, 0.0 }
  0xb3   : > { %v693_v37 = vpack.c.bf16 %v680_v34, %v679_v33 }
  0xb4   : > { %v689_v38 = vpack.c.bf16 %v673_v36, %v672_v35 }
  0xb5   : > { %704 = vst [vmem:[%s1253_s29 + $0x24] sm:$0xff] %v693_v37 }
  0xb6   : > { %699 = vst [vmem:[%s1253_s29 + $0x8] sm:$0xff] %v689_v38 }
  0xb7   : > { %v583_v43 = vpop.f32.mrf.mxu2  ;;  %v597_v44 = vpop.f32.mrf.mxu3 }
  0xb8   : > { %v584_v45 = vadd.f32 %v583_v43, %v1255_v25  ;;  %v598_v46 = vadd.f32 %v597_v44, %v1255_v25 }
  0xba   : > { %v609_v39 = vpop.f32.mrf.mxu0  ;;  %v623_v40 = vpop.f32.mrf.mxu1  ;;  %v681_v49 = vmax.f32 %v584_v45, 0.0  ;;  %v682_v50 = vmax.f32 %v598_v46, 0.0 }
  0xbb   : > { %v610_v41 = vadd.f32 %v609_v39, %v1245_v17  ;;  %v624_v42 = vadd.f32 %v623_v40, %v1245_v17 }
  0xbc   : > { %v694_v52 = vpack.c.bf16 %v682_v50, %v681_v49 }
  0xbd   : > { %v674_v47 = vmax.f32 %v610_v41, 0.0  ;;  %v675_v48 = vmax.f32 %v624_v42, 0.0 }
  0xbe   : > { %705 = vst [vmem:[%s1253_s29 + $0x2c] sm:$0xff] %v694_v52 }
  0xbf   : > { %v690_v51 = vpack.c.bf16 %v675_v48, %v674_v47 }
  0xc1   : > { %700 = vst [vmem:[%s1253_s29 + $0x10] sm:$0xff] %v690_v51  ;;  %v637_v57 = vpop.f32.mrf.mxu2 }
  0xc2   : > { %v611_v53 = vpop.f32.mrf.mxu0  ;;  %v625_v54 = vpop.f32.mrf.mxu1  ;;  %v638_v61 = vadd.f32 %v637_v57, %v1245_v17 }
  0xc3   : > { %v612_v55 = vadd.f32 %v611_v53, %v1255_v25  ;;  %v626_v56 = vadd.f32 %v625_v54, %v1255_v25  ;;  %v651_v58 = vpop.f32.mrf.mxu3 }
  0xc4   : > { %v652_v62 = vadd.f32 %v651_v58, %v1245_v17  ;;  %v676_v0 = vmax.f32 %v638_v61, 0.0 }
  0xc5   : > { %v683_v59 = vmax.f32 %v612_v55, 0.0  ;;  %v684_v60 = vmax.f32 %v626_v56, 0.0 }
  0xc6   : > { %v677_v1 = vmax.f32 %v652_v62, 0.0 }
  0xc7   : > { %v695_v63 = vpack.c.bf16 %v684_v60, %v683_v59 }
  0xc8   : > { %v691_v2 = vpack.c.bf16 %v677_v1, %v676_v0 }
  0xc9   : > { %706 = vst [vmem:[%s1253_s29 + $0x34] sm:$0xff] %v695_v63  ;;  %v639_v4 = vpop.f32.mrf.mxu2 }
  0xca   : > { %701 = vst [vmem:[%s1253_s29 + $0x18] sm:$0xff] %v691_v2  ;;  %v640_v7 = vadd.f32 %v639_v4, %v1255_v25 }
  0xcb   : > { %v653_v5 = vpop.f32.mrf.mxu3 }
  0xcc   : > { %v654_v8 = vadd.f32 %v653_v5, %v1255_v25  ;;  %v685_v10 = vmax.f32 %v640_v7, 0.0 }
  0xce   : > { %v665_v3 = vpop.f32.mrf.mxu0  ;;  %v686_v11 = vmax.f32 %v654_v8, 0.0 }
  0xcf   : > { %v666_v6 = vadd.f32 %v665_v3, %v1245_v17 }
  0xd0   : > { %v696_v13 = vpack.c.bf16 %v686_v11, %v685_v10 }
  0xd1   : > { %v678_v9 = vmax.f32 %v666_v6, 0.0 }
  0xd2   : > { %707 = vst [vmem:[%s1253_s29 + $0x3c] sm:$0xff] %v696_v13 }
  0xd3   : > { %v692_v12 = vpack.c.bf16 %v678_v9, %v678_v9 }
  0xd5   : > { %703 = vst.msk [vmem:[%s1253_s29 + $0x20] sm:$0xf] %vm702_vm2, %v692_v12 }
  0xd6   : > { %v667_v14 = vpop.f32.mrf.mxu0 }
  0xd7   : > { %v668_v15 = vadd.f32 %v667_v14, %v1255_v25 }
  0xd9   : > { %v687_v18 = vmax.f32 %v668_v15, 0.0 }
  0xdb   : > { %v697_v19 = vpack.c.bf16 %v687_v18, %v687_v18 }
  0xdd   : > { %708 = vst.msk [vmem:[%s1253_s29 + $0x44] sm:$0xf] %vm702_vm2, %v697_v19 }
  0xde PF: > { %s13_s14 = sadd.s32 1, %s1081_s14   ;;  %s1296_s12 = smov %s1077_s13 }
  0xdf   : > { %p10_p5 = scmp.ge.s32.totalorder %s13_s14, 4   ;;  %s1297_s13 = smov %s1299_s15 }
  0xe1   :  { %12 = sbr.rel (!%p10_p5) target bundleno = 2 (0x2), region = 68 }

// kernel: _decoder_forward.7
= control target key start
LH: loop header
LB: loop body
LE: loop exit
PB: predicated region body
PF: predicated region fallthrough
CT: control target
= control target key end

     0   :  { %s1896_s12 = smov 0   ;;  %s1898_s13 = smov 0   ;;  %s2245_s0 = inlined_call_operand.vmem [shape: bf16[2,36,4224], index: 0, kind: input, shape index: {}]   ;;  %s2246_s1 = inlined_call_operand.vmem [shape: bf16[8,36], index: 1, kind: input, shape index: {}]   ;;  %s2247_s2 = inlined_call_operand.vmem [shape: f32[8,1], index: 2, kind: input, shape index: {}]   ;;  %s2248_s3 = inlined_call_operand.vmem [shape: bf16[2,8,4224], index: 3, kind: output, shape index: {}]  }
   0x1   :  { %s1900_s14 = smov 0  }
   0x2 LB: > { %s25_s15 = sadd.s32 1, %s1869_s13  ;;  %p1455_p0 = scmp.ge.s32.totalorder %s1873_s14, 1  ;;  %s1873_s14 = sphi %s1900_s14, %s13_s14   ;;  %s1869_s13 = sphi %s1898_s13, %s2250_s13   ;;  %s1865_s12 = sphi %s1896_s12, %s2249_s12  }
   0x3   : > { %p27_p1 = scmp.ge.s32.totalorder %s25_s15, 2  ;;  %p169_p2 = scmp.lt.s32.totalorder %s1873_s14, 3 }
   0x5   : > { %s2252_s15 = smov (%p27_p1, %s25_s15), 0  ;;  %p170_p3 = pnand %p1455_p0, %p169_p2 }
   0x6   : > { %p205_p4 = scmp.lt.s32.totalorder (!%p170_p3), %s1865_s12, 1 }
   0x7   : > { %173 = sbr.rel (%p170_p3) target bundleno = 296 (0x128), region = 32 }
   0xc   : > { %v1875_v0 = vmov 0   ;;  %v314_v1 = vld [vmem:[%s2247_s2] sm:$0xff]  ;;  %s2254_s12 = smov (!%p205_p4, %s1865_s12), 1  ;;  %vm739_vm0 = vcmask 1041408   ;;  %vm735_vm1 = vcmask 293888  }
   0xd   : > { %1850 = vset.pattern.permute.xlu0 %v1875_v0  ;;  %s1823_s18 = smul.u32 660, %s2254_s12  ;;  %v1959_v57 = vld [vmem:[%s2246_s1] sm:$0xf] }
   0xe   : > { %317 = vperm.xlu0 %1850, %v314_v1   ;;  %s1824_s24 = smul.u32 132, %s2254_s12 }
   0xf   : > { %s1923_s21 = scalar_lea.vmem %s2245_s0, %s1823_s18 }
  0x10   : > { %v297_v2 = vld [vmem:[%s1923_s21 + $0x210] sm:$0x33]  ;;  %v298_v3 = vld [vmem:[%s1923_s21 + $0x218] sm:$0x33]  ;;  %v1592_v8 = vld [vmem:[%s1923_s21 + $0x108] sm:$0xf]  ;;  %s2186_s27 = scalar_lea.vmem %s2248_s3, %s1824_s24 }
  0x11   : > { %v537_v4 = vunpack.c.l.b16 %v297_v2  ;;  %v538_v5 = vunpack.c.h.b16 %v297_v2  ;;  %v539_v6 = vunpack.c.l.b16 %v298_v3  ;;  %v540_v7 = vunpack.c.h.b16 %v298_v3  ;;  %v1806_v9 = vld [vmem:[%s1923_s21 + $0x188] sm:$0xf0]  ;;  %v1594_v15 = vld [vmem:[%s1923_s21 + $0x18c] sm:$0xf0]  ;;  %v1807_v17 = vld [vmem:[%s1923_s21 + $0x190] sm:$0xf0] }
  0x12   : > { %v1790_v14 = vld [vmem:[%s1923_s21 + $0x10c] sm:$0xf]  ;;  %v1600_v16 = vld [vmem:[%s1923_s21 + $0x110] sm:$0xf]  ;;  %v1791_v18 = vld [vmem:[%s1923_s21 + $0x114] sm:$0xf]  ;;  %v1593_v25 = vor.u32 %v1806_v9, %v1592_v8 }
  0x13   : > { %v636_v10 = vpack.c.b16 %v537_v4, %v537_v4  ;;  %v637_v11 = vpack.c.b16 %v538_v5, %v538_v5  ;;  %v638_v12 = vpack.c.b16 %v539_v6, %v539_v6  ;;  %v639_v13 = vpack.c.b16 %v540_v7, %v540_v7  ;;  %v1602_v19 = vld [vmem:[%s1923_s21 + $0x194] sm:$0xf0]  ;;  %v1460_v24 = vld [vmem:[%s1923_s21] sm:$0xf]  ;;  %v1773_v27 = vld [vmem:[%s1923_s21 + $0x80] sm:$0xf0] }
  0x14   : > { %v1597_v26 = vor.u32 %v1790_v14, %v1594_v15  ;;  %v1757_v28 = vld [vmem:[%s1923_s21 + $0x4] sm:$0xf]  ;;  %v1601_v30 = vor.u32 %v1807_v17, %v1600_v16  ;;  %v1605_v31 = vor.u32 %v1791_v18, %v1602_v19  ;;  %v1462_v32 = vld [vmem:[%s1923_s21 + $0x84] sm:$0xf0]  ;;  %v1774_v37 = vld [vmem:[%s1923_s21 + $0x88] sm:$0xf0]  ;;  %v1461_v44 = vor.u32 %v1773_v27, %v1460_v24 }
  0x15   : > { %v741_v20 = vsel %vm739_vm0, %v636_v10, 0  ;;  %v744_v21 = vsel %vm739_vm0, %v637_v11, 0  ;;  %v747_v22 = vsel %vm739_vm0, %v638_v12, 0  ;;  %v750_v23 = vsel %vm739_vm0, %v639_v13, 0  ;;  %v299_v29 = vld [vmem:[%s1923_s21 + $0x220] sm:$0x33] }
  0x16   : > { %844 = vmatpush.bf16.msra.mxu0 %v741_v20  ;;  %857 = vmatpush.bf16.msra.mxu1 %v744_v21  ;;  %v1468_v33 = vld [vmem:[%s1923_s21 + $0x8] sm:$0xf]  ;;  %v541_v34 = vunpack.c.l.b16 %v299_v29  ;;  %v542_v35 = vunpack.c.h.b16 %v299_v29  ;;  %v1758_v38 = vld [vmem:[%s1923_s21 + $0xc] sm:$0xf]  ;;  %v1470_v39 = vld [vmem:[%s1923_s21 + $0x8c] sm:$0xf0]  ;;  %v1465_v45 = vor.u32 %v1757_v28, %v1462_v32 }
  0x17   : > { %870 = vmatpush.bf16.msra.mxu2 %v747_v22  ;;  %883 = vmatpush.bf16.msra.mxu3 %v750_v23  ;;  %v300_v36 = vld [vmem:[%s1923_s21 + $0x228] sm:$0x33]  ;;  %v1469_v46 = vor.u32 %v1774_v37, %v1468_v33  ;;  %v1473_v47 = vor.u32 %v1758_v38, %v1470_v39  ;;  %v1608_v48 = vld [vmem:[%s1923_s21 + $0x118] sm:$0xf]  ;;  %v1808_v49 = vld [vmem:[%s1923_s21 + $0x198] sm:$0xf0] }
  0x18   : > { %v543_v40 = vunpack.c.l.b16 %v300_v36  ;;  %v544_v41 = vunpack.c.h.b16 %v300_v36  ;;  %v640_v42 = vpack.c.b16 %v541_v34, %v541_v34  ;;  %v641_v43 = vpack.c.b16 %v542_v35, %v542_v35  ;;  %v1792_v52 = vld [vmem:[%s1923_s21 + $0x11c] sm:$0xf]  ;;  %v1610_v55 = vld [vmem:[%s1923_s21 + $0x19c] sm:$0xf0]  ;;  %v301_v56 = vld [vmem:[%s1923_s21 + $0x230] sm:$0x33] }
  0x19   : > { %v545_v58 = vunpack.c.l.b16 %v301_v56  ;;  %v546_v59 = vunpack.c.h.b16 %v301_v56  ;;  %v302_v60 = vld [vmem:[%s1923_s21 + $0x238] sm:$0x33]  ;;  %v1476_v61 = vld [vmem:[%s1923_s21 + $0x10] sm:$0xf]  ;;  %v1616_v62 = vld [vmem:[%s1923_s21 + $0x120] sm:$0xf]  ;;  %v1609_v0 = vor.u32 %v1808_v49, %v1608_v48  ;;  %v1613_v3 = vor.u32 %v1792_v52, %v1610_v55 }
  0x1a   : > { %845 = vmatpush.bf16.msra.mxu0 %v1593_v25  ;;  %858 = vmatpush.bf16.msra.mxu1 %v1597_v26  ;;  %v642_v50 = vpack.c.b16 %v543_v40, %v543_v40  ;;  %v643_v51 = vpack.c.b16 %v544_v41, %v544_v41  ;;  %v753_v53 = vsel %vm739_vm0, %v640_v42, 0  ;;  %v756_v54 = vsel %vm739_vm0, %v641_v43, 0  ;;  %v1809_v63 = vld [vmem:[%s1923_s21 + $0x1a0] sm:$0xf0]  ;;  %v1618_v5 = vld [vmem:[%s1923_s21 + $0x1a4] sm:$0xf0] }
  0x1b   : > { %871 = vmatpush.bf16.msra.mxu2 %v1601_v30  ;;  %884 = vmatpush.bf16.msra.mxu3 %v1605_v31  ;;  %v1793_v4 = vld [vmem:[%s1923_s21 + $0x124] sm:$0xf]  ;;  %v1775_v6 = vld [vmem:[%s1923_s21 + $0x90] sm:$0xf0]  ;;  %v1478_v8 = vld [vmem:[%s1923_s21 + $0x94] sm:$0xf0]  ;;  %v547_v9 = vunpack.c.l.b16 %v302_v60  ;;  %v548_v10 = vunpack.c.h.b16 %v302_v60  ;;  %v644_v11 = vpack.c.b16 %v545_v58, %v545_v58  ;;  %v645_v12 = vpack.c.b16 %v546_v59, %v546_v59 }
  0x1c   : > { %v759_v1 = vsel %vm739_vm0, %v642_v50, 0  ;;  %v762_v2 = vsel %vm739_vm0, %v643_v51, 0  ;;  %v1759_v7 = vld [vmem:[%s1923_s21 + $0x14] sm:$0xf]  ;;  %v1617_v13 = vor.u32 %v1809_v63, %v1616_v62  ;;  %v1621_v14 = vor.u32 %v1793_v4, %v1618_v5  ;;  %v1484_v15 = vld [vmem:[%s1923_s21 + $0x18] sm:$0xf] }
  0x1d   : > { %v1477_v16 = vor.u32 %v1775_v6, %v1476_v61  ;;  %v1481_v17 = vor.u32 %v1759_v7, %v1478_v8  ;;  %v1776_v18 = vld [vmem:[%s1923_s21 + $0x98] sm:$0xf0]  ;;  %v1486_v20 = vld [vmem:[%s1923_s21 + $0x9c] sm:$0xf0]  ;;  %v1624_v21 = vld [vmem:[%s1923_s21 + $0x128] sm:$0xf]  ;;  %v646_v23 = vpack.c.b16 %v547_v9, %v547_v9  ;;  %v647_v24 = vpack.c.b16 %v548_v10, %v548_v10 }
  0x1e   : > { %846 = vmatpush.bf16.msra.mxu0 %v1461_v44  ;;  %859 = vmatpush.bf16.msra.mxu1 %v1465_v45  ;;  %v1760_v19 = vld [vmem:[%s1923_s21 + $0x1c] sm:$0xf]  ;;  %v1810_v22 = vld [vmem:[%s1923_s21 + $0x1a8] sm:$0xf0]  ;;  %v765_v25 = vsel %vm739_vm0, %v644_v11, 0  ;;  %v768_v26 = vsel %vm739_vm0, %v645_v12, 0  ;;  %v1485_v29 = vor.u32 %v1776_v18, %v1484_v15 }
  0x1f   : > { %872 = vmatpush.bf16.msra.mxu2 %v1469_v46  ;;  %885 = vmatpush.bf16.msra.mxu3 %v1473_v47  ;;  %v1794_v27 = vld [vmem:[%s1923_s21 + $0x12c] sm:$0xf]  ;;  %v1626_v28 = vld [vmem:[%s1923_s21 + $0x1ac] sm:$0xf0]  ;;  %v1489_v30 = vor.u32 %v1760_v19, %v1486_v20  ;;  %v303_v31 = vld [vmem:[%s1923_s21 + $0x240] sm:$0x33]  ;;  %v1625_v35 = vor.u32 %v1810_v22, %v1624_v21 }
  0x20   : > { %v1632_v32 = vld [vmem:[%s1923_s21 + $0x130] sm:$0xf]  ;;  %v1811_v33 = vld [vmem:[%s1923_s21 + $0x1b0] sm:$0xf0]  ;;  %v304_v34 = vld [vmem:[%s1923_s21 + $0x248] sm:$0x33]  ;;  %v1629_v38 = vor.u32 %v1794_v27, %v1626_v28  ;;  %v549_v41 = vunpack.c.l.b16 %v303_v31  ;;  %v550_v42 = vunpack.c.h.b16 %v303_v31 }
  0x21   : > { %1722 = vmatmul.msk.bf16.vlgmr.msra.gmra.mxu0 %vm735_vm1, %v1959_v57  ;;  %1723 = vmatmul.msk.bf16.vlgmr.msra.gmra.mxu1 %vm735_vm1, %v1959_v57  ;;  %v771_v36 = vsel %vm739_vm0, %v646_v23, 0  ;;  %v774_v37 = vsel %vm739_vm0, %v647_v24, 0  ;;  %v1795_v39 = vld [vmem:[%s1923_s21 + $0x134] sm:$0xf]  ;;  %v1634_v40 = vld [vmem:[%s1923_s21 + $0x1b4] sm:$0xf0]  ;;  %v551_v45 = vunpack.c.l.b16 %v304_v34  ;;  %v552_v46 = vunpack.c.h.b16 %v304_v34 }
  0x22   : > { %896 = vmatpush.bf16.msrb.mxu0 %v753_v53  ;;  %909 = vmatpush.bf16.msrb.mxu1 %v756_v54  ;;  %v1492_v43 = vld [vmem:[%s1923_s21 + $0x20] sm:$0xf]  ;;  %v1777_v44 = vld [vmem:[%s1923_s21 + $0xa0] sm:$0xf0]  ;;  %v1633_v47 = vor.u32 %v1811_v33, %v1632_v32  ;;  %v1637_v48 = vor.u32 %v1795_v39, %v1634_v40  ;;  %v1494_v50 = vld [vmem:[%s1923_s21 + $0xa4] sm:$0xf0]  ;;  %v648_v55 = vpack.c.b16 %v549_v41, %v549_v41 }
  0x23   : > { %1724 = vmatmul.msk.bf16.vlgmr.msra.gmra.mxu2 %vm735_vm1, %v1959_v57  ;;  %1725 = vmatmul.msk.bf16.vlgmr.msra.gmra.mxu3 %vm735_vm1, %v1959_v57  ;;  %v1761_v49 = vld [vmem:[%s1923_s21 + $0x24] sm:$0xf]  ;;  %v1500_v51 = vld [vmem:[%s1923_s21 + $0x28] sm:$0xf]  ;;  %v1778_v52 = vld [vmem:[%s1923_s21 + $0xa8] sm:$0xf0]  ;;  %v649_v56 = vpack.c.b16 %v550_v42, %v550_v42  ;;  %v1493_v58 = vor.u32 %v1777_v44, %v1492_v43  ;;  %v650_v60 = vpack.c.b16 %v551_v45, %v551_v45 }
  0x24   : > { %922 = vmatpush.bf16.msrb.mxu2 %v759_v1  ;;  %935 = vmatpush.bf16.msrb.mxu3 %v762_v2  ;;  %v1762_v53 = vld [vmem:[%s1923_s21 + $0x2c] sm:$0xf]  ;;  %v1502_v54 = vld [vmem:[%s1923_s21 + $0xac] sm:$0xf0]  ;;  %v1497_v59 = vor.u32 %v1761_v49, %v1494_v50  ;;  %v651_v61 = vpack.c.b16 %v552_v46, %v552_v46  ;;  %v1501_v62 = vor.u32 %v1778_v52, %v1500_v51  ;;  %v1812_v1 = vld [vmem:[%s1923_s21 + $0x1b8] sm:$0xf0] }
  0x25   : > { %v1505_v63 = vor.u32 %v1762_v53, %v1502_v54  ;;  %v1796_v2 = vld [vmem:[%s1923_s21 + $0x13c] sm:$0xf]  ;;  %v777_v4 = vsel %vm739_vm0, %v648_v55, 0  ;;  %v780_v5 = vsel %vm739_vm0, %v649_v56, 0  ;;  %v1648_v6 = vld [vmem:[%s1923_s21 + $0x140] sm:$0xf] }
  0x26   : > { %897 = vmatpush.bf16.msrb.mxu0 %v1609_v0  ;;  %910 = vmatpush.bf16.msrb.mxu1 %v1613_v3  ;;  %v1640_v0 = vld [vmem:[%s1923_s21 + $0x138] sm:$0xf]  ;;  %v1642_v3 = vld [vmem:[%s1923_s21 + $0x1bc] sm:$0xf0]  ;;  %v1813_v7 = vld [vmem:[%s1923_s21 + $0x1c0] sm:$0xf0] }
  0x27   : > { %v783_v8 = vsel %vm739_vm0, %v650_v60, 0  ;;  %v786_v9 = vsel %vm739_vm0, %v651_v61, 0  ;;  %v1797_v10 = vld [vmem:[%s1923_s21 + $0x144] sm:$0xf]  ;;  %v1650_v11 = vld [vmem:[%s1923_s21 + $0x1c4] sm:$0xf0]  ;;  %v1649_v18 = vor.u32 %v1813_v7, %v1648_v6 }
  0x28   : > { %923 = vmatpush.bf16.msrb.mxu2 %v1617_v13  ;;  %936 = vmatpush.bf16.msrb.mxu3 %v1621_v14  ;;  %v1508_v12 = vld [vmem:[%s1923_s21 + $0x30] sm:$0xf]  ;;  %v1641_v13 = vor.u32 %v1812_v1, %v1640_v0  ;;  %v1645_v14 = vor.u32 %v1796_v2, %v1642_v3  ;;  %v1779_v15 = vld [vmem:[%s1923_s21 + $0xb0] sm:$0xf0]  ;;  %v1653_v19 = vor.u32 %v1797_v10, %v1650_v11  ;;  %v1510_v20 = vld [vmem:[%s1923_s21 + $0xb4] sm:$0xf0] }
  0x29   : > { %v1516_v21 = vld [vmem:[%s1923_s21 + $0x38] sm:$0xf]  ;;  %v1780_v23 = vld [vmem:[%s1923_s21 + $0xb8] sm:$0xf0]  ;;  %v1509_v28 = vor.u32 %v1779_v15, %v1508_v12  ;;  %v1814_v39 = vld [vmem:[%s1923_s21 + $0x1c8] sm:$0xf0] }
  0x2a   : > { %898 = vmatpush.bf16.msrb.mxu0 %v1477_v16  ;;  %911 = vmatpush.bf16.msrb.mxu1 %v1481_v17  ;;  %v1763_v16 = vld [vmem:[%s1923_s21 + $0x34] sm:$0xf]  ;;  %v306_v22 = vld [vmem:[%s1923_s21 + $0x258] sm:$0x33]  ;;  %v1517_v32 = vor.u32 %v1780_v23, %v1516_v21  ;;  %v1798_v40 = vld [vmem:[%s1923_s21 + $0x14c] sm:$0xf] }
  0x2b   : > { %v305_v17 = vld [vmem:[%s1923_s21 + $0x250] sm:$0x33]  ;;  %v1764_v24 = vld [vmem:[%s1923_s21 + $0x3c] sm:$0xf]  ;;  %v556_v31 = vunpack.c.h.b16 %v306_v22  ;;  %v1666_v49 = vld [vmem:[%s1923_s21 + $0x1d4] sm:$0xf0] }
  0x2c   : > { %924 = vmatpush.bf16.msrb.mxu2 %v1485_v29  ;;  %937 = vmatpush.bf16.msrb.mxu3 %v1489_v30  ;;  %v554_v27 = vunpack.c.h.b16 %v305_v17  ;;  %v1513_v29 = vor.u32 %v1763_v16, %v1510_v20  ;;  %v555_v30 = vunpack.c.l.b16 %v306_v22  ;;  %v1658_v41 = vld [vmem:[%s1923_s21 + $0x1cc] sm:$0xf0]  ;;  %v1815_v45 = vld [vmem:[%s1923_s21 + $0x1d0] sm:$0xf0]  ;;  %v1524_v52 = vld [vmem:[%s1923_s21 + $0x40] sm:$0xf] }
  0x2d   : > { %v1664_v44 = vld [vmem:[%s1923_s21 + $0x150] sm:$0xf]  ;;  %v1661_v51 = vor.u32 %v1798_v40, %v1658_v41  ;;  %v1781_v53 = vld [vmem:[%s1923_s21 + $0xc0] sm:$0xf0]  ;;  %v1782_v60 = vld [vmem:[%s1923_s21 + $0xc8] sm:$0xf0] }
  0x2e   : > { %948 = vmatpush.bf16.msra.mxu0 %v765_v25  ;;  %961 = vmatpush.bf16.msra.mxu1 %v768_v26  ;;  %v1518_v25 = vld [vmem:[%s1923_s21 + $0xbc] sm:$0xf0]  ;;  %v553_v26 = vunpack.c.l.b16 %v305_v17  ;;  %v1765_v54 = vld [vmem:[%s1923_s21 + $0x44] sm:$0xf]  ;;  %v1665_v55 = vor.u32 %v1815_v45, %v1664_v44  ;;  %v1766_v61 = vld [vmem:[%s1923_s21 + $0x4c] sm:$0xf]  ;;  %v1525_v1 = vor.u32 %v1781_v53, %v1524_v52 }
  0x2f   : > { %v1521_v33 = vor.u32 %v1764_v24, %v1518_v25  ;;  %v308_v0 = vld [vmem:[%s1923_s21 + $0x268] sm:$0x33]  ;;  %v1800_v15 = vld [vmem:[%s1923_s21 + $0x15c] sm:$0xf]  ;;  %v1674_v16 = vld [vmem:[%s1923_s21 + $0x1dc] sm:$0xf0] }
  0x30   : > { %974 = vmatpush.bf16.msra.mxu2 %v771_v36  ;;  %987 = vmatpush.bf16.msra.mxu3 %v774_v37  ;;  %v652_v34 = vpack.c.b16 %v553_v26, %v553_v26  ;;  %v654_v36 = vpack.c.b16 %v555_v30, %v555_v30  ;;  %v655_v37 = vpack.c.b16 %v556_v31, %v556_v31  ;;  %v559_v7 = vunpack.c.l.b16 %v308_v0  ;;  %v1817_v20 = vld [vmem:[%s1923_s21 + $0x1e0] sm:$0xf0]  ;;  %v1682_v24 = vld [vmem:[%s1923_s21 + $0x1e4] sm:$0xf0]  ;;  %v1818_v52 = vld [vmem:[%s1923_s21 + $0x1e8] sm:$0xf0] }
  0x31   : > { %1726 = vmatmul.msk.bf16.vlgmr.msrb.gmra.mxu0 %vm735_vm1, %v1959_v57  ;;  %1727 = vmatmul.msk.bf16.vlgmr.msrb.gmra.mxu1 %vm735_vm1, %v1959_v57  ;;  %v1801_v23 = vld [vmem:[%s1923_s21 + $0x164] sm:$0xf]  ;;  %v1677_v26 = vor.u32 %v1800_v15, %v1674_v16  ;;  %v1802_v53 = vld [vmem:[%s1923_s21 + $0x16c] sm:$0xf] }
  0x32   : > { %949 = vmatpush.bf16.msra.mxu0 %v1625_v35  ;;  %962 = vmatpush.bf16.msra.mxu1 %v1629_v38  ;;  %v653_v35 = vpack.c.b16 %v554_v27, %v554_v27  ;;  %v1656_v38 = vld [vmem:[%s1923_s21 + $0x148] sm:$0xf]  ;;  %v789_v42 = vsel %vm739_vm0, %v652_v34, 0  ;;  %v795_v46 = vsel %vm739_vm0, %v654_v36, 0  ;;  %v658_v11 = vpack.c.b16 %v559_v7, %v559_v7  ;;  %v1540_v27 = vld [vmem:[%s1923_s21 + $0x50] sm:$0xf] }
  0x33   : > { %1728 = vmatmul.msk.bf16.vlgmr.msrb.gmra.mxu2 %vm735_vm1, %v1959_v57  ;;  %1729 = vmatmul.msk.bf16.vlgmr.msrb.gmra.mxu3 %vm735_vm1, %v1959_v57  ;;  %v1657_v50 = vor.u32 %v1814_v39, %v1656_v38  ;;  %v1685_v31 = vor.u32 %v1801_v23, %v1682_v24  ;;  %v1784_v34 = vld [vmem:[%s1923_s21 + $0xd8] sm:$0xf0]  ;;  %v1550_v36 = vld [vmem:[%s1923_s21 + $0xdc] sm:$0xf0]  ;;  %v1558_v7 = vld [vmem:[%s1923_s21 + $0xe4] sm:$0xf0] }
  0x34   : > { %975 = vmatpush.bf16.msra.mxu2 %v1633_v47  ;;  %988 = vmatpush.bf16.msra.mxu3 %v1637_v48  ;;  %v792_v43 = vsel %vm739_vm0, %v653_v35, 0  ;;  %v798_v47 = vsel %vm739_vm0, %v655_v37, 0  ;;  %v1799_v48 = vld [vmem:[%s1923_s21 + $0x154] sm:$0xf]  ;;  %v807_v21 = vsel %vm739_vm0, %v658_v11, 0 }
  0x35   : > { %v1669_v56 = vor.u32 %v1799_v48, %v1666_v49  ;;  %v1768_v35 = vld [vmem:[%s1923_s21 + $0x5c] sm:$0xf]  ;;  %v309_v37 = vld [vmem:[%s1923_s21 + $0x270] sm:$0x33] }
  0x36   : > { %950 = vmatpush.bf16.msra.mxu0 %v1493_v58  ;;  %963 = vmatpush.bf16.msra.mxu1 %v1497_v59  ;;  %v1526_v58 = vld [vmem:[%s1923_s21 + $0xc4] sm:$0xf0]  ;;  %v310_v38 = vld [vmem:[%s1923_s21 + $0x278] sm:$0x33]  ;;  %v562_v44 = vunpack.c.h.b16 %v309_v37  ;;  %v1566_v11 = vld [vmem:[%s1923_s21 + $0xec] sm:$0xf0] }
  0x37   : > { %v1532_v59 = vld [vmem:[%s1923_s21 + $0x48] sm:$0xf]  ;;  %v1529_v2 = vor.u32 %v1765_v54, %v1526_v58  ;;  %v563_v45 = vunpack.c.l.b16 %v310_v38  ;;  %v1690_v54 = vld [vmem:[%s1923_s21 + $0x1ec] sm:$0xf0] }
  0x38   : > { %976 = vmatpush.bf16.msra.mxu2 %v1501_v62  ;;  %989 = vmatpush.bf16.msra.mxu3 %v1505_v63  ;;  %v1534_v62 = vld [vmem:[%s1923_s21 + $0xcc] sm:$0xf0]  ;;  %v307_v63 = vld [vmem:[%s1923_s21 + $0x260] sm:$0x33]  ;;  %v1533_v3 = vor.u32 %v1782_v60, %v1532_v59  ;;  %v661_v48 = vpack.c.b16 %v562_v44, %v562_v44  ;;  %v1819_v59 = vld [vmem:[%s1923_s21 + $0x1f0] sm:$0xf0] }
  0x39   : > { %v558_v6 = vunpack.c.h.b16 %v307_v63  ;;  %v662_v49 = vpack.c.b16 %v563_v45, %v563_v45  ;;  %v1696_v58 = vld [vmem:[%s1923_s21 + $0x170] sm:$0xf]  ;;  %v1574_v45 = vld [vmem:[%s1923_s21 + $0xf4] sm:$0xf0] }
  0x3a   : > { %1000 = vmatpush.bf16.msrb.mxu0 %v777_v4  ;;  %1013 = vmatpush.bf16.msrb.mxu1 %v780_v5  ;;  %v1537_v4 = vor.u32 %v1766_v61, %v1534_v62  ;;  %v557_v5 = vunpack.c.l.b16 %v307_v63  ;;  %v1803_v62 = vld [vmem:[%s1923_s21 + $0x174] sm:$0xf]  ;;  %v1698_v63 = vld [vmem:[%s1923_s21 + $0x1f4] sm:$0xf0] }
  0x3b   : > { %v657_v10 = vpack.c.b16 %v558_v6, %v558_v6  ;;  %v819_v60 = vsel %vm739_vm0, %v662_v49, 0  ;;  %v1701_v6 = vor.u32 %v1803_v62, %v1698_v63  ;;  %v1582_v49 = vld [vmem:[%s1923_s21 + $0xfc] sm:$0xf0]  ;;  %v1789_v63 = vld [vmem:[%s1923_s21 + $0x100] sm:$0xf0] }
  0x3c   : > { %1026 = vmatpush.bf16.msrb.mxu2 %v783_v8  ;;  %1039 = vmatpush.bf16.msrb.mxu3 %v786_v9  ;;  %v560_v8 = vunpack.c.h.b16 %v308_v0  ;;  %v656_v9 = vpack.c.b16 %v557_v5, %v557_v5  ;;  %v1697_v5 = vor.u32 %v1819_v59, %v1696_v58  ;;  %v1720_v59 = vld [vmem:[%s1923_s21 + $0x188] sm:$0xf]  ;;  %v1588_v62 = vld [vmem:[%s1923_s21 + $0x80] sm:$0xf] }
  0x3e   : > { %1001 = vmatpush.bf16.msrb.mxu0 %v1641_v13  ;;  %1014 = vmatpush.bf16.msrb.mxu1 %v1645_v14  ;;  %v659_v12 = vpack.c.b16 %v560_v8, %v560_v8  ;;  %v1672_v13 = vld [vmem:[%s1923_s21 + $0x158] sm:$0xf]  ;;  %v1816_v14 = vld [vmem:[%s1923_s21 + $0x1d8] sm:$0xf0]  ;;  %v801_v17 = vsel %vm739_vm0, %v656_v9, 0 }
  0x3f   : > { %v1673_v25 = vor.u32 %v1816_v14, %v1672_v13  ;;  %v1564_v8 = vld [vmem:[%s1923_s21 + $0x68] sm:$0xf]  ;;  %v1786_v9 = vld [vmem:[%s1923_s21 + $0xe8] sm:$0xf0] }
  0x40   : > { %1027 = vmatpush.bf16.msrb.mxu2 %v1649_v18  ;;  %1040 = vmatpush.bf16.msrb.mxu3 %v1653_v19  ;;  %v804_v18 = vsel %vm739_vm0, %v657_v10, 0  ;;  %v1680_v19 = vld [vmem:[%s1923_s21 + $0x160] sm:$0xf]  ;;  %v810_v22 = vsel %vm739_vm0, %v659_v12, 0  ;;  %v1770_v10 = vld [vmem:[%s1923_s21 + $0x6c] sm:$0xf]  ;;  %v1565_v16 = vor.u32 %v1786_v9, %v1564_v8 }
  0x41   : > { %1730 = vmatmul.msk.bf16.vlgmr.msra.gmra.mxu0 %vm735_vm1, %v1959_v57  ;;  %1731 = vmatmul.msk.bf16.vlgmr.msra.gmra.mxu1 %vm735_vm1, %v1959_v57  ;;  %v1681_v30 = vor.u32 %v1817_v20, %v1680_v19  ;;  %v311_v12 = vld [vmem:[%s1923_s21 + $0x280] sm:$0x33]  ;;  %v312_v13 = vld [vmem:[%s1923_s21 + $0x288] sm:$0x33] }
  0x42   : > { %1002 = vmatpush.bf16.msrb.mxu0 %v1509_v28  ;;  %1015 = vmatpush.bf16.msrb.mxu1 %v1513_v29  ;;  %v1783_v28 = vld [vmem:[%s1923_s21 + $0xd0] sm:$0xf0]  ;;  %v566_v19 = vunpack.c.h.b16 %v311_v12  ;;  %v567_v20 = vunpack.c.l.b16 %v312_v13 }
  0x43   : > { %1732 = vmatmul.msk.bf16.vlgmr.msra.gmra.mxu2 %vm735_vm1, %v1959_v57  ;;  %1733 = vmatmul.msk.bf16.vlgmr.msra.gmra.mxu3 %vm735_vm1, %v1959_v57  ;;  %v1767_v29 = vld [vmem:[%s1923_s21 + $0x54] sm:$0xf]  ;;  %v1541_v39 = vor.u32 %v1783_v28, %v1540_v27  ;;  %v1820_v27 = vld [vmem:[%s1923_s21 + $0x1f8] sm:$0xf0] }
  0x44   : > { %1028 = vmatpush.bf16.msrb.mxu2 %v1517_v32  ;;  %1041 = vmatpush.bf16.msrb.mxu3 %v1521_v33  ;;  %v1542_v32 = vld [vmem:[%s1923_s21 + $0xd4] sm:$0xf0]  ;;  %v665_v23 = vpack.c.b16 %v566_v19, %v566_v19  ;;  %v666_v24 = vpack.c.b16 %v567_v20, %v567_v20  ;;  %v1804_v28 = vld [vmem:[%s1923_s21 + $0x17c] sm:$0xf] }
  0x45   : > { %v1548_v33 = vld [vmem:[%s1923_s21 + $0x58] sm:$0xf]  ;;  %v1545_v40 = vor.u32 %v1767_v29, %v1542_v32  ;;  %v1706_v29 = vld [vmem:[%s1923_s21 + $0x1fc] sm:$0xf0] }
  0x46   : > { %1052 = vmatpush.bf16.msra.mxu0 %v789_v42  ;;  %1065 = vmatpush.bf16.msra.mxu1 %v792_v43  ;;  %v1549_v41 = vor.u32 %v1784_v34, %v1548_v33  ;;  %v1553_v42 = vor.u32 %v1768_v35, %v1550_v36  ;;  %v561_v43 = vunpack.c.l.b16 %v309_v37  ;;  %v1712_v32 = vld [vmem:[%s1923_s21 + $0x180] sm:$0xf]  ;;  %v1821_v33 = vld [vmem:[%s1923_s21 + $0x200] sm:$0xf0]  ;;  %v831_v34 = vsel %vm739_vm0, %v666_v24, 0 }
  0x47   : > { %v1805_v36 = vld [vmem:[%s1923_s21 + $0x184] sm:$0xf]  ;;  %v1714_v37 = vld [vmem:[%s1923_s21 + $0x204] sm:$0xf0] }
  0x48   : > { %1078 = vmatpush.bf16.msra.mxu2 %v795_v46  ;;  %1091 = vmatpush.bf16.msra.mxu3 %v798_v47  ;;  %v564_v46 = vunpack.c.h.b16 %v310_v38  ;;  %v660_v47 = vpack.c.b16 %v561_v43, %v561_v43  ;;  %v1713_v43 = vor.u32 %v1821_v33, %v1712_v32  ;;  %v1717_v44 = vor.u32 %v1805_v36, %v1714_v37 }
  0x4a   : > { %1053 = vmatpush.bf16.msra.mxu0 %v1657_v50  ;;  %1066 = vmatpush.bf16.msra.mxu1 %v1661_v51  ;;  %v663_v50 = vpack.c.b16 %v564_v46, %v564_v46  ;;  %v1688_v51 = vld [vmem:[%s1923_s21 + $0x168] sm:$0xf]  ;;  %v1580_v46 = vld [vmem:[%s1923_s21 + $0x78] sm:$0xf] }
  0x4b   : > { %v1689_v0 = vor.u32 %v1818_v52, %v1688_v51 }
  0x4c   : > { %1079 = vmatpush.bf16.msra.mxu2 %v1665_v55  ;;  %1092 = vmatpush.bf16.msra.mxu3 %v1669_v56  ;;  %v813_v55 = vsel %vm739_vm0, %v660_v47, 0  ;;  %v816_v56 = vsel %vm739_vm0, %v661_v48, 0  ;;  %v822_v61 = vsel %vm739_vm0, %v663_v50, 0  ;;  %v1788_v47 = vld [vmem:[%s1923_s21 + $0xf8] sm:$0xf0] }
  0x4d   : > { %v1772_v48 = vld [vmem:[%s1923_s21 + $0x7c] sm:$0xf]  ;;  %v313_v50 = vld [vmem:[%s1923_s21 + $0x290] sm:$0x3] }
  0x4e   : > { %1054 = vmatpush.bf16.msra.mxu0 %v1525_v1  ;;  %1067 = vmatpush.bf16.msra.mxu1 %v1529_v2  ;;  %v1693_v1 = vor.u32 %v1802_v53, %v1690_v54  ;;  %v1556_v2 = vld [vmem:[%s1923_s21 + $0x60] sm:$0xf]  ;;  %v1581_v53 = vor.u32 %v1788_v47, %v1580_v46  ;;  %v1585_v54 = vor.u32 %v1772_v48, %v1582_v49 }
  0x50   : > { %1080 = vmatpush.bf16.msra.mxu2 %v1533_v3  ;;  %1093 = vmatpush.bf16.msra.mxu3 %v1537_v4  ;;  %v1785_v3 = vld [vmem:[%s1923_s21 + $0xe0] sm:$0xf0] }
  0x51   : > { %1734 = vmatmul.msk.bf16.vlgmr.msrb.gmra.mxu0 %vm735_vm1, %v1959_v57  ;;  %1735 = vmatmul.msk.bf16.vlgmr.msrb.gmra.mxu1 %vm735_vm1, %v1959_v57  ;;  %v1769_v4 = vld [vmem:[%s1923_s21 + $0x64] sm:$0xf]  ;;  %v1557_v14 = vor.u32 %v1785_v3, %v1556_v2 }
  0x52   : > { %1104 = vmatpush.bf16.msrb.mxu0 %v801_v17  ;;  %1117 = vmatpush.bf16.msrb.mxu1 %v804_v18  ;;  %v1561_v15 = vor.u32 %v1769_v4, %v1558_v7  ;;  %v1569_v17 = vor.u32 %v1770_v10, %v1566_v11  ;;  %v565_v18 = vunpack.c.l.b16 %v311_v12 }
  0x53   : > { %1736 = vmatmul.msk.bf16.vlgmr.msrb.gmra.mxu2 %vm735_vm1, %v1959_v57  ;;  %1737 = vmatmul.msk.bf16.vlgmr.msrb.gmra.mxu3 %vm735_vm1, %v1959_v57 }
  0x54   : > { %1130 = vmatpush.bf16.msrb.mxu2 %v807_v21  ;;  %1143 = vmatpush.bf16.msrb.mxu3 %v810_v22  ;;  %v568_v21 = vunpack.c.h.b16 %v312_v13  ;;  %v664_v22 = vpack.c.b16 %v565_v18, %v565_v18 }
  0x56   : > { %1105 = vmatpush.bf16.msrb.mxu0 %v1673_v25  ;;  %1118 = vmatpush.bf16.msrb.mxu1 %v1677_v26  ;;  %v667_v25 = vpack.c.b16 %v568_v21, %v568_v21  ;;  %v1704_v26 = vld [vmem:[%s1923_s21 + $0x178] sm:$0xf] }
  0x57   : > { %v1705_v38 = vor.u32 %v1820_v27, %v1704_v26 }
  0x58   : > { %1131 = vmatpush.bf16.msrb.mxu2 %v1681_v30  ;;  %1144 = vmatpush.bf16.msrb.mxu3 %v1685_v31  ;;  %v825_v30 = vsel %vm739_vm0, %v664_v22, 0  ;;  %v828_v31 = vsel %vm739_vm0, %v665_v23, 0  ;;  %v834_v35 = vsel %vm739_vm0, %v667_v25, 0 }
  0x5a   : > { %1106 = vmatpush.bf16.msrb.mxu0 %v1541_v39  ;;  %1119 = vmatpush.bf16.msrb.mxu1 %v1545_v40  ;;  %v1709_v39 = vor.u32 %v1804_v28, %v1706_v29  ;;  %v1572_v40 = vld [vmem:[%s1923_s21 + $0x70] sm:$0xf] }
  0x5c   : > { %1132 = vmatpush.bf16.msrb.mxu2 %v1549_v41  ;;  %1145 = vmatpush.bf16.msrb.mxu3 %v1553_v42  ;;  %v1787_v41 = vld [vmem:[%s1923_s21 + $0xf0] sm:$0xf0] }
  0x5d   : > { %v1771_v42 = vld [vmem:[%s1923_s21 + $0x74] sm:$0xf]  ;;  %v1573_v51 = vor.u32 %v1787_v41, %v1572_v40 }
  0x5e   : > { %v1577_v52 = vor.u32 %v1771_v42, %v1574_v45 }
  0x61   : > { %1738 = vmatmul.msk.bf16.vlgmr.msra.gmra.mxu0 %vm735_vm1, %v1959_v57  ;;  %1739 = vmatmul.msk.bf16.vlgmr.msra.gmra.mxu1 %vm735_vm1, %v1959_v57 }
  0x62   : > { %1156 = vmatpush.bf16.msra.mxu0 %v813_v55  ;;  %1169 = vmatpush.bf16.msra.mxu1 %v816_v56  ;;  %v569_v55 = vunpack.c.l.b16 %v313_v50 }
  0x63   : > { %1740 = vmatmul.msk.bf16.vlgmr.msra.gmra.mxu2 %vm735_vm1, %v1959_v57  ;;  %1741 = vmatmul.msk.bf16.vlgmr.msra.gmra.mxu3 %vm735_vm1, %v1959_v57 }
  0x64   : > { %1182 = vmatpush.bf16.msra.mxu2 %v819_v60  ;;  %1195 = vmatpush.bf16.msra.mxu3 %v822_v61  ;;  %v668_v56 = vpack.c.b16 %v569_v55, %v569_v55  ;;  %v1822_v60 = vld [vmem:[%s1923_s21 + $0x208] sm:$0xf0] }
  0x65   : > { %v1721_v61 = vor.u32 %v1822_v60, %v1720_v59 }
  0x66   : > { %1157 = vmatpush.bf16.msra.mxu0 %v1689_v0  ;;  %1170 = vmatpush.bf16.msra.mxu1 %v1693_v1  ;;  %v837_v58 = vsel %vm739_vm0, %v668_v56, 0  ;;  %v1589_v0 = vor.u32 %v1789_v63, %v1588_v62 }
  0x68   : > { %1183 = vmatpush.bf16.msra.mxu2 %v1697_v5  ;;  %1196 = vmatpush.bf16.msra.mxu3 %v1701_v6 }
  0x6a   : > { %1158 = vmatpush.bf16.msra.mxu0 %v1557_v14  ;;  %1171 = vmatpush.bf16.msra.mxu1 %v1561_v15 }
  0x6c   : > { %1184 = vmatpush.bf16.msra.mxu2 %v1565_v16  ;;  %1197 = vmatpush.bf16.msra.mxu3 %v1569_v17 }
  0x71   : > { %1742 = vmatmul.msk.bf16.vlgmr.msrb.gmra.mxu0 %vm735_vm1, %v1959_v57  ;;  %1743 = vmatmul.msk.bf16.vlgmr.msrb.gmra.mxu1 %vm735_vm1, %v1959_v57 }
  0x72   : > { %1208 = vmatpush.bf16.msrb.mxu0 %v825_v30  ;;  %1221 = vmatpush.bf16.msrb.mxu1 %v828_v31 }
  0x73   : > { %1744 = vmatmul.msk.bf16.vlgmr.msrb.gmra.mxu2 %vm735_vm1, %v1959_v57  ;;  %1745 = vmatmul.msk.bf16.vlgmr.msrb.gmra.mxu3 %vm735_vm1, %v1959_v57 }
  0x74   : > { %1234 = vmatpush.bf16.msrb.mxu2 %v831_v34  ;;  %1247 = vmatpush.bf16.msrb.mxu3 %v834_v35 }
  0x76   : > { %1209 = vmatpush.bf16.msrb.mxu0 %v1705_v38  ;;  %1222 = vmatpush.bf16.msrb.mxu1 %v1709_v39 }
  0x78   : > { %1235 = vmatpush.bf16.msrb.mxu2 %v1713_v43  ;;  %1248 = vmatpush.bf16.msrb.mxu3 %v1717_v44 }
  0x7a   : > { %1210 = vmatpush.bf16.msrb.mxu0 %v1573_v51  ;;  %1223 = vmatpush.bf16.msrb.mxu1 %v1577_v52 }
  0x7c   : > { %1236 = vmatpush.bf16.msrb.mxu2 %v1581_v53  ;;  %1249 = vmatpush.bf16.msrb.mxu3 %v1585_v54 }
  0x80   : > { %v2176_v1 = vpop.permute.xlu0 %317 }
  0x81   : > { %1746 = vmatmul.msk.bf16.vlgmr.msra.gmra.mxu0 %vm735_vm1, %v1959_v57  ;;  %1747 = vmatmul.msk.bf16.vlgmr.msra.gmra.mxu1 %vm735_vm1, %v1959_v57 }
  0x82   : > { %1260 = vmatpush.bf16.msra.mxu0 %v837_v58 }
  0x83   : > { %1748 = vmatmul.msk.bf16.vlgmr.msra.gmra.mxu2 %vm735_vm1, %v1959_v57  ;;  %1749 = vmatmul.msk.bf16.vlgmr.msra.gmra.mxu3 %vm735_vm1, %v1959_v57 }
  0x86   : > { %1261 = vmatpush.bf16.msra.mxu0 %v1721_v61 }
  0x8a   : > { %1262 = vmatpush.bf16.msra.mxu0 %v1589_v0 }
  0x91   : > { %1750 = vmatmul.msk.bf16.vlgmr.msrb.gmra.mxu0 %vm735_vm1, %v1959_v57  ;;  %1751 = vmatmul.msk.bf16.vlgmr.msrb.gmra.mxu1 %vm735_vm1, %v1959_v57 }
  0x93   : > { %1752 = vmatmul.msk.bf16.vlgmr.msrb.gmra.mxu2 %vm735_vm1, %v1959_v57  ;;  %1753 = vmatmul.msk.bf16.vlgmr.msrb.gmra.mxu3 %vm735_vm1, %v1959_v57 }
  0x9e   : > { %v848_v2 = vpop.f32.mrf.mxu0  ;;  %v861_v3 = vpop.f32.mrf.mxu1 }
  0x9f   : > { %v849_v4 = vadd.f32 %v848_v2, %v2176_v1  ;;  %v862_v5 = vadd.f32 %v861_v3, %v2176_v1 }
  0xa1   : > { %v1268_v6 = vmax.f32 %v849_v4, 0.0  ;;  %v1269_v7 = vmax.f32 %v862_v5, 0.0  ;;  %1754 = vmatmul.msk.bf16.vlgmr.msra.gmra.mxu0 %vm735_vm1, %v1959_v57 }
  0xa3   : > { %v1301_v8 = vpack.c.bf16 %v1269_v7, %v1268_v6 }
  0xa5   : > { %1318 = vst [vmem:[%s2186_s27] sm:$0xff] %v1301_v8 }
  0xa6   : > { %v874_v9 = vpop.f32.mrf.mxu2  ;;  %v887_v10 = vpop.f32.mrf.mxu3 }
  0xa7   : > { %v850_v11 = vpop.f32.mrf.mxu0  ;;  %v863_v12 = vpop.f32.mrf.mxu1  ;;  %v875_v13 = vadd.f32 %v874_v9, %v2176_v1  ;;  %v888_v14 = vadd.f32 %v887_v10, %v2176_v1 }
  0xa9   : > { %v1270_v15 = vmax.f32 %v875_v13, 0.0  ;;  %v1271_v57 = vmax.f32 %v888_v14, 0.0 }
  0xab   : > { %v1302_v16 = vpack.c.bf16 %v1271_v57, %v1270_v15 }
  0xad   : > { %1319 = vst [vmem:[%s2186_s27 + $0x8] sm:$0xff] %v1302_v16 }
  0xae   : > { %v876_v17 = vpop.f32.mrf.mxu2  ;;  %v889_v18 = vpop.f32.mrf.mxu3 }
  0xaf   : > { %v900_v19 = vpop.f32.mrf.mxu0  ;;  %v913_v20 = vpop.f32.mrf.mxu1 }
  0xb0   : > { %v901_v21 = vadd.f32 %v900_v19, %v2176_v1  ;;  %v914_v22 = vadd.f32 %v913_v20, %v2176_v1 }
  0xb2   : > { %v1272_v23 = vmax.f32 %v901_v21, 0.0  ;;  %v1273_v24 = vmax.f32 %v914_v22, 0.0 }
  0xb4   : > { %v1303_v25 = vpack.c.bf16 %v1273_v24, %v1272_v23 }
  0xb6   : > { %1320 = vst [vmem:[%s2186_s27 + $0x10] sm:$0xff] %v1303_v25  ;;  %v926_v26 = vpop.f32.mrf.mxu2  ;;  %v939_v27 = vpop.f32.mrf.mxu3 }
  0xb7   : > { %v902_v28 = vpop.f32.mrf.mxu0  ;;  %v915_v29 = vpop.f32.mrf.mxu1  ;;  %v927_v30 = vadd.f32 %v926_v26, %v2176_v1  ;;  %v940_v31 = vadd.f32 %v939_v27, %v2176_v1 }
  0xb9   : > { %v1274_v32 = vmax.f32 %v927_v30, 0.0  ;;  %v1275_v33 = vmax.f32 %v940_v31, 0.0 }
  0xbb   : > { %v1304_v34 = vpack.c.bf16 %v1275_v33, %v1274_v32 }
  0xbd   : > { %1321 = vst [vmem:[%s2186_s27 + $0x18] sm:$0xff] %v1304_v34 }
  0xbe   : > { %v928_v35 = vpop.f32.mrf.mxu2  ;;  %v941_v36 = vpop.f32.mrf.mxu3 }
  0xbf   : > { %v952_v37 = vpop.f32.mrf.mxu0  ;;  %v965_v38 = vpop.f32.mrf.mxu1 }
  0xc0   : > { %v953_v39 = vadd.f32 %v952_v37, %v2176_v1  ;;  %v966_v40 = vadd.f32 %v965_v38, %v2176_v1 }
  0xc2   : > { %v1276_v41 = vmax.f32 %v953_v39, 0.0  ;;  %v1277_v42 = vmax.f32 %v966_v40, 0.0 }
  0xc4   : > { %v1305_v43 = vpack.c.bf16 %v1277_v42, %v1276_v41 }
  0xc6   : > { %1322 = vst [vmem:[%s2186_s27 + $0x20] sm:$0xff] %v1305_v43  ;;  %v978_v44 = vpop.f32.mrf.mxu2  ;;  %v991_v45 = vpop.f32.mrf.mxu3 }
  0xc7   : > { %v954_v46 = vpop.f32.mrf.mxu0  ;;  %v967_v47 = vpop.f32.mrf.mxu1  ;;  %v979_v48 = vadd.f32 %v978_v44, %v2176_v1  ;;  %v992_v49 = vadd.f32 %v991_v45, %v2176_v1 }
  0xc9   : > { %v1278_v50 = vmax.f32 %v979_v48, 0.0  ;;  %v1279_v51 = vmax.f32 %v992_v49, 0.0 }
  0xcb   : > { %v1306_v52 = vpack.c.bf16 %v1279_v51, %v1278_v50 }
  0xcd   : > { %1323 = vst [vmem:[%s2186_s27 + $0x28] sm:$0xff] %v1306_v52 }
  0xce   : > { %v980_v53 = vpop.f32.mrf.mxu2  ;;  %v993_v54 = vpop.f32.mrf.mxu3 }
  0xcf   : > { %v1004_v55 = vpop.f32.mrf.mxu0  ;;  %v1017_v56 = vpop.f32.mrf.mxu1 }
  0xd0   : > { %v1005_v58 = vadd.f32 %v1004_v55, %v2176_v1  ;;  %v1018_v59 = vadd.f32 %v1017_v56, %v2176_v1 }
  0xd2   : > { %v1280_v60 = vmax.f32 %v1005_v58, 0.0  ;;  %v1281_v61 = vmax.f32 %v1018_v59, 0.0 }
  0xd4   : > { %v1307_v62 = vpack.c.bf16 %v1281_v61, %v1280_v60 }
  0xd6   : > { %1324 = vst [vmem:[%s2186_s27 + $0x30] sm:$0xff] %v1307_v62  ;;  %v1030_v63 = vpop.f32.mrf.mxu2  ;;  %v1043_v0 = vpop.f32.mrf.mxu3 }
  0xd7   : > { %v1006_v2 = vpop.f32.mrf.mxu0  ;;  %v1019_v3 = vpop.f32.mrf.mxu1  ;;  %v1031_v4 = vadd.f32 %v1030_v63, %v2176_v1  ;;  %v1044_v5 = vadd.f32 %v1043_v0, %v2176_v1 }
  0xd9   : > { %v1282_v6 = vmax.f32 %v1031_v4, 0.0  ;;  %v1283_v7 = vmax.f32 %v1044_v5, 0.0 }
  0xdb   : > { %v1308_v8 = vpack.c.bf16 %v1283_v7, %v1282_v6 }
  0xdd   : > { %1325 = vst [vmem:[%s2186_s27 + $0x38] sm:$0xff] %v1308_v8 }
  0xde   : > { %v1032_v9 = vpop.f32.mrf.mxu2  ;;  %v1045_v10 = vpop.f32.mrf.mxu3 }
  0xdf   : > { %v1056_v11 = vpop.f32.mrf.mxu0  ;;  %v1069_v12 = vpop.f32.mrf.mxu1 }
  0xe0   : > { %v1057_v13 = vadd.f32 %v1056_v11, %v2176_v1  ;;  %v1070_v14 = vadd.f32 %v1069_v12, %v2176_v1 }
  0xe2   : > { %v1284_v15 = vmax.f32 %v1057_v13, 0.0  ;;  %v1285_v57 = vmax.f32 %v1070_v14, 0.0 }
  0xe4   : > { %v1309_v16 = vpack.c.bf16 %v1285_v57, %v1284_v15 }
  0xe6   : > { %1326 = vst [vmem:[%s2186_s27 + $0x40] sm:$0xff] %v1309_v16  ;;  %v1082_v17 = vpop.f32.mrf.mxu2  ;;  %v1095_v18 = vpop.f32.mrf.mxu3 }
  0xe7   : > { %v1058_v19 = vpop.f32.mrf.mxu0  ;;  %v1071_v20 = vpop.f32.mrf.mxu1  ;;  %v1083_v21 = vadd.f32 %v1082_v17, %v2176_v1  ;;  %v1096_v22 = vadd.f32 %v1095_v18, %v2176_v1 }
  0xe9   : > { %v1286_v23 = vmax.f32 %v1083_v21, 0.0  ;;  %v1287_v24 = vmax.f32 %v1096_v22, 0.0 }
  0xeb   : > { %v1310_v25 = vpack.c.bf16 %v1287_v24, %v1286_v23 }
  0xed   : > { %1327 = vst [vmem:[%s2186_s27 + $0x48] sm:$0xff] %v1310_v25 }
  0xee   : > { %v1084_v26 = vpop.f32.mrf.mxu2  ;;  %v1097_v27 = vpop.f32.mrf.mxu3 }
  0xef   : > { %v1108_v28 = vpop.f32.mrf.mxu0  ;;  %v1121_v29 = vpop.f32.mrf.mxu1 }
  0xf0   : > { %v1109_v30 = vadd.f32 %v1108_v28, %v2176_v1  ;;  %v1122_v31 = vadd.f32 %v1121_v29, %v2176_v1 }
  0xf2   : > { %v1288_v32 = vmax.f32 %v1109_v30, 0.0  ;;  %v1289_v33 = vmax.f32 %v1122_v31, 0.0 }
  0xf4   : > { %v1311_v34 = vpack.c.bf16 %v1289_v33, %v1288_v32 }
  0xf6   : > { %1328 = vst [vmem:[%s2186_s27 + $0x50] sm:$0xff] %v1311_v34  ;;  %v1134_v35 = vpop.f32.mrf.mxu2  ;;  %v1147_v36 = vpop.f32.mrf.mxu3 }
  0xf7   : > { %v1110_v37 = vpop.f32.mrf.mxu0  ;;  %v1123_v38 = vpop.f32.mrf.mxu1  ;;  %v1135_v39 = vadd.f32 %v1134_v35, %v2176_v1  ;;  %v1148_v40 = vadd.f32 %v1147_v36, %v2176_v1 }
  0xf9   : > { %v1290_v41 = vmax.f32 %v1135_v39, 0.0  ;;  %v1291_v42 = vmax.f32 %v1148_v40, 0.0 }
  0xfb   : > { %v1312_v43 = vpack.c.bf16 %v1291_v42, %v1290_v41 }
  0xfd   : > { %1329 = vst [vmem:[%s2186_s27 + $0x58] sm:$0xff] %v1312_v43 }
  0xfe   : > { %v1136_v44 = vpop.f32.mrf.mxu2  ;;  %v1149_v45 = vpop.f32.mrf.mxu3 }
  0xff   : > { %v1160_v46 = vpop.f32.mrf.mxu0  ;;  %v1173_v47 = vpop.f32.mrf.mxu1 }
 0x100   : > { %v1161_v48 = vadd.f32 %v1160_v46, %v2176_v1  ;;  %v1174_v49 = vadd.f32 %v1173_v47, %v2176_v1 }
 0x102   : > { %v1292_v50 = vmax.f32 %v1161_v48, 0.0  ;;  %v1293_v51 = vmax.f32 %v1174_v49, 0.0 }
 0x104   : > { %v1313_v52 = vpack.c.bf16 %v1293_v51, %v1292_v50 }
 0x106   : > { %1330 = vst [vmem:[%s2186_s27 + $0x60] sm:$0xff] %v1313_v52  ;;  %v1186_v53 = vpop.f32.mrf.mxu2  ;;  %v1199_v54 = vpop.f32.mrf.mxu3 }
 0x107   : > { %v1162_v55 = vpop.f32.mrf.mxu0  ;;  %v1175_v56 = vpop.f32.mrf.mxu1  ;;  %v1187_v58 = vadd.f32 %v1186_v53, %v2176_v1  ;;  %v1200_v59 = vadd.f32 %v1199_v54, %v2176_v1 }
 0x109   : > { %v1294_v60 = vmax.f32 %v1187_v58, 0.0  ;;  %v1295_v61 = vmax.f32 %v1200_v59, 0.0 }
 0x10b   : > { %v1314_v62 = vpack.c.bf16 %v1295_v61, %v1294_v60 }
 0x10d   : > { %1331 = vst [vmem:[%s2186_s27 + $0x68] sm:$0xff] %v1314_v62 }
 0x10e   : > { %v1188_v63 = vpop.f32.mrf.mxu2  ;;  %v1201_v0 = vpop.f32.mrf.mxu3 }
 0x10f   : > { %v1212_v2 = vpop.f32.mrf.mxu0  ;;  %v1225_v3 = vpop.f32.mrf.mxu1 }
 0x110   : > { %v1213_v4 = vadd.f32 %v1212_v2, %v2176_v1  ;;  %v1226_v5 = vadd.f32 %v1225_v3, %v2176_v1 }
 0x112   : > { %v1296_v6 = vmax.f32 %v1213_v4, 0.0  ;;  %v1297_v7 = vmax.f32 %v1226_v5, 0.0 }
 0x114   : > { %v1315_v8 = vpack.c.bf16 %v1297_v7, %v1296_v6 }
 0x116   : > { %1332 = vst [vmem:[%s2186_s27 + $0x70] sm:$0xff] %v1315_v8  ;;  %v1238_v9 = vpop.f32.mrf.mxu2  ;;  %v1251_v10 = vpop.f32.mrf.mxu3 }
 0x117   : > { %v1214_v11 = vpop.f32.mrf.mxu0  ;;  %v1239_v12 = vadd.f32 %v1238_v9, %v2176_v1  ;;  %v1252_v13 = vadd.f32 %v1251_v10, %v2176_v1  ;;  %v1227_v14 = vpop.f32.mrf.mxu1 }
 0x119   : > { %v1298_v15 = vmax.f32 %v1239_v12, 0.0  ;;  %v1299_v57 = vmax.f32 %v1252_v13, 0.0 }
 0x11b   : > { %v1316_v16 = vpack.c.bf16 %v1299_v57, %v1298_v15 }
 0x11d   : > { %1333 = vst [vmem:[%s2186_s27 + $0x78] sm:$0xff] %v1316_v16 }
 0x11e   : > { %v1240_v17 = vpop.f32.mrf.mxu2  ;;  %v1253_v18 = vpop.f32.mrf.mxu3 }
 0x11f   : > { %v1264_v19 = vpop.f32.mrf.mxu0 }
 0x120   : > { %v1265_v20 = vadd.f32 %v1264_v19, %v2176_v1 }
 0x122   : > { %v1300_v21 = vmax.f32 %v1265_v20, 0.0 }
 0x124   : > { %v1317_v22 = vpack.c.bf16 %v1300_v21, %v1300_v21 }
 0x126   : > { %1334 = vst [vmem:[%s2186_s27 + $0x80] sm:$0xf] %v1317_v22 }
 0x127   : > { %v1266_v23 = vpop.f32.mrf.mxu0 }
 0x128 PF: > { %s13_s14 = sadd.s32 1, %s1873_s14   ;;  %s2249_s12 = smov %s1869_s13 }
 0x129   : > { %p10_p5 = scmp.ge.s32.totalorder %s13_s14, 4   ;;  %s2250_s13 = smov %s2252_s15 }
 0x12b   :  { %12 = sbr.rel (!%p10_p5) target bundleno = 2 (0x2), region = 68 }

</bundles_post_ra>
